<compile_context>
chip_gen: v6e
topology: v6e:2x2x1
jax: 0.10.0
libtpu: 0.0.40
codegen_flags: <defaults>
</compile_context>

<pallas_src>
import math
from functools import partial

import numpy as np
import jax
import jax.numpy as jnp
from jax import lax
from jax.experimental import pallas as pl
from jax.experimental.pallas import tpu as pltpu  # noqa: F401  (kept for parity; no scratch needed now)

# ----------------------------- scaled-down BERT config -----------------------------
VOCAB = 128
MAX_POS = 32
HIDDEN = 32
NUM_LAYERS = 2
NUM_HEADS = 2
HEAD_DIM = HIDDEN // NUM_HEADS
INTERMEDIATE = 64
NUM_CLASSES = 2
LN_EPS = 1e-12
SLAB_LANES = 128


# ----------------------------- static slab layout (rows, 128 lanes) ----------------
def _build_layout():
    layout = {}
    cursor = [0]

    def alloc(name, rows, cols):
        layout[name] = (cursor[0], rows, cols)
        cursor[0] += ((rows + 7) // 8) * 8  # 8-row (sublane) aligned offsets

    alloc("word_emb", VOCAB, HIDDEN)
    alloc("pos_emb", MAX_POS, HIDDEN)          # pos_emb + type_emb[0] folded at pack time
    alloc("emb_ln_g", 1, HIDDEN)
    alloc("emb_ln_b", 1, HIDDEN)
    for l in range(NUM_LAYERS):
        alloc(f"qkv_w{l}", HIDDEN, 3 * HIDDEN)  # q columns pre-scaled by 1/sqrt(head_dim)
        alloc(f"qkv_b{l}", 1, 3 * HIDDEN)
        alloc(f"ao_w{l}", HIDDEN, HIDDEN)
        alloc(f"ao_b{l}", 1, HIDDEN)
        alloc(f"ln1_g{l}", 1, HIDDEN)
        alloc(f"ln1_b{l}", 1, HIDDEN)
        alloc(f"i_w{l}", HIDDEN, INTERMEDIATE)
        alloc(f"i_b{l}", 1, INTERMEDIATE)
        alloc(f"o2_w{l}", INTERMEDIATE, HIDDEN)
        alloc(f"o2_b{l}", 1, HIDDEN)
        alloc(f"ln2_g{l}", 1, HIDDEN)
        alloc(f"ln2_b{l}", 1, HIDDEN)
    alloc("pool_w", HIDDEN, HIDDEN)
    alloc("pool_b", 1, HIDDEN)
    alloc("fc_w", HIDDEN, NUM_CLASSES)
    alloc("fc_b", 1, NUM_CLASSES)
    total_rows = ((cursor[0] + 7) // 8) * 8
    return layout, total_rows


_LAYOUT, _SLAB_ROWS = _build_layout()


# --------------------------------- fused kernel ------------------------------------
def _layer_norm(x, g, b):
    mu = jnp.mean(x, axis=-1, keepdims=True)
    var = jnp.mean(jnp.square(x - mu), axis=-1, keepdims=True)
    return (x - mu) * lax.rsqrt(var + LN_EPS) * g + b


def _gelu(x):
    # TODO(synk): HF BERT uses erf-GELU; tanh approximation used here.
    c = math.sqrt(2.0 / math.pi)
    return 0.5 * x * (1.0 + jnp.tanh(c * (x + 0.044715 * x * x * x)))


def _fused_bert_kernel(ids_ref, mask_ref, slab_ref, out_ref, *, batch, seq):
    H, NH, dH = HIDDEN, NUM_HEADS, HEAD_DIM
    BS = batch * seq

    def W(name):
        off, r, c = _LAYOUT[name]
        return slab_ref[off:off + r, 0:c]       # static slice of the packed weight slab

    # ---- embeddings: lane-dense one-hot matmul over the 128-entry vocab ----
    ids = ids_ref[...]                                              # (B*S, 1) int32
    col = lax.broadcasted_iota(jnp.int32, (BS, VOCAB), 1)
    onehot = (col == ids).astype(jnp.float32)                       # (B*S, 128)
    word = jnp.dot(onehot, W("word_emb"), preferred_element_type=jnp.float32)
    pos = W("pos_emb")[0:seq, :]                                    # (S, H) incl. type_emb[0]
    emb = word + jnp.concatenate([pos] * batch, axis=0)             # (B*S, H)
    x = _layer_norm(emb, W("emb_ln_g"), W("emb_ln_b"))

    # ---- additive attention mask, built in-kernel ----
    addmask = (1.0 - mask_ref[...].astype(jnp.float32)) * -1e9      # (B, S)

    # ---- encoder layers (static unroll; all weights are static slab slices) ----
    for l in range(NUM_LAYERS):
        qkv = jnp.dot(x, W(f"qkv_w{l}"), preferred_element_type=jnp.float32) + W(f"qkv_b{l}")
        q = qkv[:, 0:H]            # already scaled by 1/sqrt(dH) (folded at pack time)
        k = qkv[:, H:2 * H]
        v = qkv[:, 2 * H:3 * H]
        ao_w = W(f"ao_w{l}")

        attn_parts = []
        for b in range(batch):
            m_b = addmask[b:b + 1, :]                               # (1, S)
            r0 = b * seq
            acc = None
            for h in range(NH):
                c0 = h * dH
                q_bh = q[r0:r0 + seq, c0:c0 + dH]                   # (S, dH)
                k_bh = k[r0:r0 + seq, c0:c0 + dH]
                v_bh = v[r0:r0 + seq, c0:c0 + dH]
                # contract head_dim of both operands directly (no explicit k.T)
                s = lax.dot_general(q_bh, k_bh, (((1,), (1,)), ((), ())),
                                    preferred_element_type=jnp.float32)
                s = s + m_b
                e = jnp.exp(s - jnp.max(s, axis=-1, keepdims=True))
                p = e * pl.reciprocal(jnp.sum(e, axis=-1, keepdims=True), approx=True)
                ctx = jnp.dot(p, v_bh, preferred_element_type=jnp.float32)       # (S, dH)
                # fold output projection of this head in vregs (no ctx scratch round trip)
                part = jnp.dot(ctx, ao_w[c0:c0 + dH, :], preferred_element_type=jnp.float32)
                acc = part if acc is None else acc + part
            attn_parts.append(acc)
        attn_out = jnp.concatenate(attn_parts, axis=0) + W(f"ao_b{l}")           # (B*S, H)

        h1 = _layer_norm(x + attn_out, W(f"ln1_g{l}"), W(f"ln1_b{l}"))
        inter = _gelu(jnp.dot(h1, W(f"i_w{l}"),
                              preferred_element_type=jnp.float32) + W(f"i_b{l}"))
        ffn = jnp.dot(inter, W(f"o2_w{l}"),
                      preferred_element_type=jnp.float32) + W(f"o2_b{l}")
        x = _layer_norm(h1 + ffn, W(f"ln2_g{l}"), W(f"ln2_b{l}"))

    # ---- pooler on [CLS] rows (static slices) + classification head ----
    cls = jnp.concatenate([x[b * seq:b * seq + 1, :] for b in range(batch)], axis=0)  # (B, H)
    pooled = jnp.tanh(jnp.dot(cls, W("pool_w"),
                              preferred_element_type=jnp.float32) + W("pool_b"))
    out_ref[...] = jnp.dot(pooled, W("fc_w"),
                           preferred_element_type=jnp.float32) + W("fc_b")


# --------------------------------- params ------------------------------------------
def init_params(key):
    keys = iter(jax.random.split(key, 8 + 12 * NUM_LAYERS))

    def nrm(shape):
        return jax.random.normal(next(keys), shape, jnp.float32) * 0.02

    params = {
        "word_emb": nrm((VOCAB, HIDDEN)),
        "pos_emb": nrm((MAX_POS, HIDDEN)),
        "type_emb": nrm((2, HIDDEN)),
        "emb_ln_g": jnp.ones((HIDDEN,), jnp.float32),
        "emb_ln_b": jnp.zeros((HIDDEN,), jnp.float32),
        "pool_w": nrm((HIDDEN, HIDDEN)),
        "pool_b": jnp.zeros((HIDDEN,), jnp.float32),
        "fc_w": nrm((HIDDEN, NUM_CLASSES)),
        "fc_b": jnp.zeros((NUM_CLASSES,), jnp.float32),
        "layers": [],
    }
    for _ in range(NUM_LAYERS):
        params["layers"].append({
            "q_w": nrm((HIDDEN, HIDDEN)), "q_b": jnp.zeros((HIDDEN,), jnp.float32),
            "k_w": nrm((HIDDEN, HIDDEN)), "k_b": jnp.zeros((HIDDEN,), jnp.float32),
            "v_w": nrm((HIDDEN, HIDDEN)), "v_b": jnp.zeros((HIDDEN,), jnp.float32),
            "o_w": nrm((HIDDEN, HIDDEN)), "o_b": jnp.zeros((HIDDEN,), jnp.float32),
            "ln1_g": jnp.ones((HIDDEN,), jnp.float32), "ln1_b": jnp.zeros((HIDDEN,), jnp.float32),
            "i_w": nrm((HIDDEN, INTERMEDIATE)), "i_b": jnp.zeros((INTERMEDIATE,), jnp.float32),
            "o2_w": nrm((INTERMEDIATE, HIDDEN)), "o2_b": jnp.zeros((HIDDEN,), jnp.float32),
            "ln2_g": jnp.ones((HIDDEN,), jnp.float32), "ln2_b": jnp.zeros((HIDDEN,), jnp.float32),
        })
    return params


def pack_params(params):
    """One-off host-side packing of all weights into a single (rows, 128) f32 slab."""
    slab = np.zeros((_SLAB_ROWS, SLAB_LANES), np.float32)

    def put(name, arr):
        arr = np.asarray(arr, np.float32)
        if arr.ndim == 1:
            arr = arr[None, :]
        off, r, c = _LAYOUT[name]
        assert arr.shape == (r, c), (name, arr.shape, (r, c))
        slab[off:off + r, 0:c] = arr

    scale = 1.0 / math.sqrt(HEAD_DIM)
    put("word_emb", params["word_emb"])
    put("pos_emb", np.asarray(params["pos_emb"]) + np.asarray(params["type_emb"])[0][None, :])
    put("emb_ln_g", params["emb_ln_g"])
    put("emb_ln_b", params["emb_ln_b"])
    for l, lp in enumerate(params["layers"]):
        qkv_w = np.concatenate([np.asarray(lp["q_w"]) * scale,       # fold 1/sqrt(dH) into q
                                np.asarray(lp["k_w"]),
                                np.asarray(lp["v_w"])], axis=1)
        qkv_b = np.concatenate([np.asarray(lp["q_b"]) * scale,
                                np.asarray(lp["k_b"]),
                                np.asarray(lp["v_b"])])
        put(f"qkv_w{l}", qkv_w)
        put(f"qkv_b{l}", qkv_b)
        put(f"ao_w{l}", lp["o_w"]); put(f"ao_b{l}", lp["o_b"])
        put(f"ln1_g{l}", lp["ln1_g"]); put(f"ln1_b{l}", lp["ln1_b"])
        put(f"i_w{l}", lp["i_w"]); put(f"i_b{l}", lp["i_b"])
        put(f"o2_w{l}", lp["o2_w"]); put(f"o2_b{l}", lp["o2_b"])
        put(f"ln2_g{l}", lp["ln2_g"]); put(f"ln2_b{l}", lp["ln2_b"])
    put("pool_w", params["pool_w"]); put("pool_b", params["pool_b"])
    put("fc_w", params["fc_w"]); put("fc_b", params["fc_b"])
    return jnp.asarray(slab)


# --------------------------------- forward (single device launch) -------------------
@jax.jit
def sentiment_analyzer(slab, input_ids, attention_mask):
    """input_ids: (B, S) int32, attention_mask: (B, S) int32 -> logits (B, 2) f32."""
    B, S = input_ids.shape
    ids2d = input_ids.astype(jnp.int32).reshape(B * S, 1)   # free view; lookup happens in-kernel
    kernel = partial(_fused_bert_kernel, batch=B, seq=S)
    return pl.pallas_call(
        kernel,
        out_shape=jax.ShapeDtypeStruct((B, NUM_CLASSES), jnp.float32),
    )(ids2d, attention_mask.astype(jnp.int32), slab)


if __name__ == "__main__":
    key = jax.random.PRNGKey(0)
    pkey, ikey = jax.random.split(key)
    params = init_params(pkey)
    slab = pack_params(params)

    B, S = 2, 8
    input_ids = jax.random.randint(ikey, (B, S), 0, VOCAB, dtype=jnp.int32)
    attention_mask = jnp.ones((B, S), dtype=jnp.int32).at[1, 6:].set(0)  # pad last 2 tokens of ex. 1

    logits = sentiment_analyzer(slab, input_ids, attention_mask)
    jax.block_until_ready(logits)
    assert logits.shape == (B, NUM_CLASSES) and logits.dtype == jnp.float32
    assert bool(jnp.all(jnp.isfinite(logits)))
    print("KERNEL_OK")
</pallas_src>

<mosaic_0001>
module attributes {stable_mosaic.version = 11 : i64} {
  func.func @_fused_bert_kernel(%arg0: memref<16x1xi32, #tpu.memory_space<vmem>>, %arg1: memref<2x8xi32, #tpu.memory_space<vmem>>, %arg2: memref<704x128xf32, #tpu.memory_space<vmem>>, %arg3: memref<2x2xf32, #tpu.memory_space<vmem>>) attributes {dimension_semantics = [], scalar_prefetch = 0 : i64, scratch_operands = 0 : i64, tpu.core_type = #tpu.core_type<tc>} {
    %c0 = arith.constant 0 : index
    %c0_0 = arith.constant 0 : index
    %0 = vector.load %arg0[%c0, %c0_0] : memref<16x1xi32, #tpu.memory_space<vmem>>, vector<16x1xi32>
    %1 = tpu.iota {dimensions = array<i32: 1>} : vector<16x128xi32>
    %2 = vector.broadcast %0 : vector<16x1xi32> to vector<16x128xi32>
    %3 = arith.cmpi eq, %1, %2 : vector<16x128xi32>
    %4 = arith.extui %3 : vector<16x128xi1> to vector<16x128xi32>
    %5 = arith.sitofp %4 : vector<16x128xi32> to vector<16x128xf32>
    %c0_1 = arith.constant 0 : index
    %c0_2 = arith.constant 0 : index
    %6 = vector.load %arg2[%c0_1, %c0_2] : memref<704x128xf32, #tpu.memory_space<vmem>>, vector<128x32xf32>
    %cst = arith.constant dense<0.000000e+00> : vector<16x32xf32>
    %7 = tpu.matmul %5, %6, %cst {dimension_numbers = #tpu.dot_dimension_numbers<[1], [0], [0], [1], [0, 0, 1, 1], [], []>} : vector<16x128xf32>, vector<128x32xf32>, vector<16x32xf32> -> vector<16x32xf32>
    %c128 = arith.constant 128 : index
    %c0_3 = arith.constant 0 : index
    %8 = vector.load %arg2[%c128, %c0_3] : memref<704x128xf32, #tpu.memory_space<vmem>>, vector<32x32xf32>
    %9 = vector.extract_strided_slice %8 {offsets = [0, 0], sizes = [8, 32], strides = [1, 1]} : vector<32x32xf32> to vector<8x32xf32>
    %10 = tpu.concatenate %9, %9 in 0 : vector<8x32xf32>, vector<8x32xf32> -> vector<16x32xf32>
    %11 = arith.addf %7, %10 : vector<16x32xf32>
    %c160 = arith.constant 160 : index
    %c0_4 = arith.constant 0 : index
    %12 = vector.load %arg2[%c160, %c0_4] : memref<704x128xf32, #tpu.memory_space<vmem>>, vector<1x32xf32>
    %c168 = arith.constant 168 : index
    %c0_5 = arith.constant 0 : index
    %13 = vector.load %arg2[%c168, %c0_5] : memref<704x128xf32, #tpu.memory_space<vmem>>, vector<1x32xf32>
    %cst_6 = arith.constant dense<0.000000e+00> : vector<16xf32>
    %14 = vector.multi_reduction <add>, %11, %cst_6 [1] : vector<16x32xf32> to vector<16xf32>
    %15 = vector.shape_cast %14 : vector<16xf32> to vector<16x1xf32>
    %cst_7 = arith.constant 3.200000e+01 : f32
    %16 = vector.broadcast %cst_7 : f32 to vector<16x1xf32>
    %17 = arith.divf %15, %16 : vector<16x1xf32>
    %18 = vector.broadcast %17 : vector<16x1xf32> to vector<16x32xf32>
    %19 = arith.subf %11, %18 : vector<16x32xf32>
    %20 = arith.mulf %19, %19 : vector<16x32xf32>
    %cst_8 = arith.constant dense<0.000000e+00> : vector<16xf32>
    %21 = vector.multi_reduction <add>, %20, %cst_8 [1] : vector<16x32xf32> to vector<16xf32>
    %22 = vector.shape_cast %21 : vector<16xf32> to vector<16x1xf32>
    %cst_9 = arith.constant 3.200000e+01 : f32
    %23 = vector.broadcast %cst_9 : f32 to vector<16x1xf32>
    %24 = arith.divf %22, %23 : vector<16x1xf32>
    %25 = vector.broadcast %17 : vector<16x1xf32> to vector<16x32xf32>
    %26 = arith.subf %11, %25 : vector<16x32xf32>
    %cst_10 = arith.constant 9.99999996E-13 : f32
    %27 = vector.broadcast %cst_10 : f32 to vector<16x1xf32>
    %28 = arith.addf %24, %27 : vector<16x1xf32>
    %29 = math.rsqrt %28 : vector<16x1xf32>
    %30 = vector.broadcast %29 : vector<16x1xf32> to vector<16x32xf32>
    %31 = arith.mulf %26, %30 : vector<16x32xf32>
    %32 = vector.broadcast %12 : vector<1x32xf32> to vector<16x32xf32>
    %33 = arith.mulf %31, %32 : vector<16x32xf32>
    %34 = vector.broadcast %13 : vector<1x32xf32> to vector<16x32xf32>
    %35 = arith.addf %33, %34 : vector<16x32xf32>
    %c0_11 = arith.constant 0 : index
    %c0_12 = arith.constant 0 : index
    %36 = vector.load %arg1[%c0_11, %c0_12] : memref<2x8xi32, #tpu.memory_space<vmem>>, vector<2x8xi32>
    %37 = arith.sitofp %36 : vector<2x8xi32> to vector<2x8xf32>
    %cst_13 = arith.constant 1.000000e+00 : f32
    %38 = vector.broadcast %cst_13 : f32 to vector<2x8xf32>
    %39 = arith.subf %38, %37 : vector<2x8xf32>
    %cst_14 = arith.constant -1.000000e+09 : f32
    %40 = vector.broadcast %cst_14 : f32 to vector<2x8xf32>
    %41 = arith.mulf %39, %40 : vector<2x8xf32>
    %c176 = arith.constant 176 : index
    %c0_15 = arith.constant 0 : index
    %42 = vector.load %arg2[%c176, %c0_15] : memref<704x128xf32, #tpu.memory_space<vmem>>, vector<32x96xf32>
    %cst_16 = arith.constant dense<0.000000e+00> : vector<16x96xf32>
    %43 = tpu.matmul %35, %42, %cst_16 {dimension_numbers = #tpu.dot_dimension_numbers<[1], [0], [0], [1], [0, 0, 1, 1], [], []>} : vector<16x32xf32>, vector<32x96xf32>, vector<16x96xf32> -> vector<16x96xf32>
    %c208 = arith.constant 208 : index
    %c0_17 = arith.constant 0 : index
    %44 = vector.load %arg2[%c208, %c0_17] : memref<704x128xf32, #tpu.memory_space<vmem>>, vector<1x96xf32>
    %45 = vector.broadcast %44 : vector<1x96xf32> to vector<16x96xf32>
    %46 = arith.addf %43, %45 : vector<16x96xf32>
    %47 = vector.extract_strided_slice %46 {offsets = [0, 0], sizes = [16, 32], strides = [1, 1]} : vector<16x96xf32> to vector<16x32xf32>
    %48 = vector.extract_strided_slice %46 {offsets = [0, 32], sizes = [16, 32], strides = [1, 1]} : vector<16x96xf32> to vector<16x32xf32>
    %49 = vector.extract_strided_slice %46 {offsets = [0, 64], sizes = [16, 32], strides = [1, 1]} : vector<16x96xf32> to vector<16x32xf32>
    %c216 = arith.constant 216 : index
    %c0_18 = arith.constant 0 : index
    %50 = vector.load %arg2[%c216, %c0_18] : memref<704x128xf32, #tpu.memory_space<vmem>>, vector<32x32xf32>
    %51 = vector.extract_strided_slice %41 {offsets = [0, 0], sizes = [1, 8], strides = [1, 1]} : vector<2x8xf32> to vector<1x8xf32>
    %52 = vector.extract_strided_slice %47 {offsets = [0, 0], sizes = [8, 16], strides = [1, 1]} : vector<16x32xf32> to vector<8x16xf32>
    %53 = vector.extract_strided_slice %48 {offsets = [0, 0], sizes = [8, 16], strides = [1, 1]} : vector<16x32xf32> to vector<8x16xf32>
    %54 = vector.extract_strided_slice %49 {offsets = [0, 0], sizes = [8, 16], strides = [1, 1]} : vector<16x32xf32> to vector<8x16xf32>
    %cst_19 = arith.constant dense<0.000000e+00> : vector<8x8xf32>
    %55 = tpu.matmul %52, %53, %cst_19 {dimension_numbers = #tpu.dot_dimension_numbers<[1], [1], [0], [0], [0, 0, 1, 0], [], []>} : vector<8x16xf32>, vector<8x16xf32>, vector<8x8xf32> -> vector<8x8xf32>
    %56 = vector.broadcast %51 : vector<1x8xf32> to vector<8x8xf32>
    %57 = arith.addf %55, %56 : vector<8x8xf32>
    %cst_20 = arith.constant dense<0xFF800000> : vector<8xf32>
    %58 = vector.multi_reduction <maximumf>, %57, %cst_20 [1] : vector<8x8xf32> to vector<8xf32>
    %59 = vector.shape_cast %58 : vector<8xf32> to vector<8x1xf32>
    %60 = vector.broadcast %59 : vector<8x1xf32> to vector<8x8xf32>
    %61 = arith.subf %57, %60 : vector<8x8xf32>
    %62 = math.exp %61 : vector<8x8xf32>
    %cst_21 = arith.constant dense<0.000000e+00> : vector<8xf32>
    %63 = vector.multi_reduction <add>, %62, %cst_21 [1] : vector<8x8xf32> to vector<8xf32>
    %64 = vector.shape_cast %63 : vector<8xf32> to vector<8x1xf32>
    %65 = tpu.reciprocal %64 {approx = true} : vector<8x1xf32> -> vector<8x1xf32>
    %66 = vector.broadcast %65 : vector<8x1xf32> to vector<8x8xf32>
    %67 = arith.mulf %62, %66 : vector<8x8xf32>
    %cst_22 = arith.constant dense<0.000000e+00> : vector<8x16xf32>
    %68 = tpu.matmul %67, %54, %cst_22 {dimension_numbers = #tpu.dot_dimension_numbers<[1], [0], [0], [1], [0, 0, 1, 1], [], []>} : vector<8x8xf32>, vector<8x16xf32>, vector<8x16xf32> -> vector<8x16xf32>
    %69 = vector.extract_strided_slice %50 {offsets = [0, 0], sizes = [16, 32], strides = [1, 1]} : vector<32x32xf32> to vector<16x32xf32>
    %cst_23 = arith.constant dense<0.000000e+00> : vector<8x32xf32>
    %70 = tpu.matmul %68, %69, %cst_23 {dimension_numbers = #tpu.dot_dimension_numbers<[1], [0], [0], [1], [0, 0, 1, 1], [], []>} : vector<8x16xf32>, vector<16x32xf32>, vector<8x32xf32> -> vector<8x32xf32>
    %71 = vector.extract_strided_slice %47 {offsets = [0, 16], sizes = [8, 16], strides = [1, 1]} : vector<16x32xf32> to vector<8x16xf32>
    %72 = vector.extract_strided_slice %48 {offsets = [0, 16], sizes = [8, 16], strides = [1, 1]} : vector<16x32xf32> to vector<8x16xf32>
    %73 = vector.extract_strided_slice %49 {offsets = [0, 16], sizes = [8, 16], strides = [1, 1]} : vector<16x32xf32> to vector<8x16xf32>
    %cst_24 = arith.constant dense<0.000000e+00> : vector<8x8xf32>
    %74 = tpu.matmul %71, %72, %cst_24 {dimension_numbers = #tpu.dot_dimension_numbers<[1], [1], [0], [0], [0, 0, 1, 0], [], []>} : vector<8x16xf32>, vector<8x16xf32>, vector<8x8xf32> -> vector<8x8xf32>
    %75 = vector.broadcast %51 : vector<1x8xf32> to vector<8x8xf32>
    %76 = arith.addf %74, %75 : vector<8x8xf32>
    %cst_25 = arith.constant dense<0xFF800000> : vector<8xf32>
    %77 = vector.multi_reduction <maximumf>, %76, %cst_25 [1] : vector<8x8xf32> to vector<8xf32>
    %78 = vector.shape_cast %77 : vector<8xf32> to vector<8x1xf32>
    %79 = vector.broadcast %78 : vector<8x1xf32> to vector<8x8xf32>
    %80 = arith.subf %76, %79 : vector<8x8xf32>
    %81 = math.exp %80 : vector<8x8xf32>
    %cst_26 = arith.constant dense<0.000000e+00> : vector<8xf32>
    %82 = vector.multi_reduction <add>, %81, %cst_26 [1] : vector<8x8xf32> to vector<8xf32>
    %83 = vector.shape_cast %82 : vector<8xf32> to vector<8x1xf32>
    %84 = tpu.reciprocal %83 {approx = true} : vector<8x1xf32> -> vector<8x1xf32>
    %85 = vector.broadcast %84 : vector<8x1xf32> to vector<8x8xf32>
    %86 = arith.mulf %81, %85 : vector<8x8xf32>
    %cst_27 = arith.constant dense<0.000000e+00> : vector<8x16xf32>
    %87 = tpu.matmul %86, %73, %cst_27 {dimension_numbers = #tpu.dot_dimension_numbers<[1], [0], [0], [1], [0, 0, 1, 1], [], []>} : vector<8x8xf32>, vector<8x16xf32>, vector<8x16xf32> -> vector<8x16xf32>
    %88 = vector.extract_strided_slice %50 {offsets = [16, 0], sizes = [16, 32], strides = [1, 1]} : vector<32x32xf32> to vector<16x32xf32>
    %cst_28 = arith.constant dense<0.000000e+00> : vector<8x32xf32>
    %89 = tpu.matmul %87, %88, %cst_28 {dimension_numbers = #tpu.dot_dimension_numbers<[1], [0], [0], [1], [0, 0, 1, 1], [], []>} : vector<8x16xf32>, vector<16x32xf32>, vector<8x32xf32> -> vector<8x32xf32>
    %90 = arith.addf %70, %89 : vector<8x32xf32>
    %91 = vector.extract_strided_slice %41 {offsets = [1, 0], sizes = [1, 8], strides = [1, 1]} : vector<2x8xf32> to vector<1x8xf32>
    %92 = vector.extract_strided_slice %47 {offsets = [8, 0], sizes = [8, 16], strides = [1, 1]} : vector<16x32xf32> to vector<8x16xf32>
    %93 = vector.extract_strided_slice %48 {offsets = [8, 0], sizes = [8, 16], strides = [1, 1]} : vector<16x32xf32> to vector<8x16xf32>
    %94 = vector.extract_strided_slice %49 {offsets = [8, 0], sizes = [8, 16], strides = [1, 1]} : vector<16x32xf32> to vector<8x16xf32>
    %cst_29 = arith.constant dense<0.000000e+00> : vector<8x8xf32>
    %95 = tpu.matmul %92, %93, %cst_29 {dimension_numbers = #tpu.dot_dimension_numbers<[1], [1], [0], [0], [0, 0, 1, 0], [], []>} : vector<8x16xf32>, vector<8x16xf32>, vector<8x8xf32> -> vector<8x8xf32>
    %96 = vector.broadcast %91 : vector<1x8xf32> to vector<8x8xf32>
    %97 = arith.addf %95, %96 : vector<8x8xf32>
    %cst_30 = arith.constant dense<0xFF800000> : vector<8xf32>
    %98 = vector.multi_reduction <maximumf>, %97, %cst_30 [1] : vector<8x8xf32> to vector<8xf32>
    %99 = vector.shape_cast %98 : vector<8xf32> to vector<8x1xf32>
    %100 = vector.broadcast %99 : vector<8x1xf32> to vector<8x8xf32>
    %101 = arith.subf %97, %100 : vector<8x8xf32>
    %102 = math.exp %101 : vector<8x8xf32>
    %cst_31 = arith.constant dense<0.000000e+00> : vector<8xf32>
    %103 = vector.multi_reduction <add>, %102, %cst_31 [1] : vector<8x8xf32> to vector<8xf32>
    %104 = vector.shape_cast %103 : vector<8xf32> to vector<8x1xf32>
    %105 = tpu.reciprocal %104 {approx = true} : vector<8x1xf32> -> vector<8x1xf32>
    %106 = vector.broadcast %105 : vector<8x1xf32> to vector<8x8xf32>
    %107 = arith.mulf %102, %106 : vector<8x8xf32>
    %cst_32 = arith.constant dense<0.000000e+00> : vector<8x16xf32>
    %108 = tpu.matmul %107, %94, %cst_32 {dimension_numbers = #tpu.dot_dimension_numbers<[1], [0], [0], [1], [0, 0, 1, 1], [], []>} : vector<8x8xf32>, vector<8x16xf32>, vector<8x16xf32> -> vector<8x16xf32>
    %109 = vector.extract_strided_slice %50 {offsets = [0, 0], sizes = [16, 32], strides = [1, 1]} : vector<32x32xf32> to vector<16x32xf32>
    %cst_33 = arith.constant dense<0.000000e+00> : vector<8x32xf32>
    %110 = tpu.matmul %108, %109, %cst_33 {dimension_numbers = #tpu.dot_dimension_numbers<[1], [0], [0], [1], [0, 0, 1, 1], [], []>} : vector<8x16xf32>, vector<16x32xf32>, vector<8x32xf32> -> vector<8x32xf32>
    %111 = vector.extract_strided_slice %47 {offsets = [8, 16], sizes = [8, 16], strides = [1, 1]} : vector<16x32xf32> to vector<8x16xf32>
    %112 = vector.extract_strided_slice %48 {offsets = [8, 16], sizes = [8, 16], strides = [1, 1]} : vector<16x32xf32> to vector<8x16xf32>
    %113 = vector.extract_strided_slice %49 {offsets = [8, 16], sizes = [8, 16], strides = [1, 1]} : vector<16x32xf32> to vector<8x16xf32>
    %cst_34 = arith.constant dense<0.000000e+00> : vector<8x8xf32>
    %114 = tpu.matmul %111, %112, %cst_34 {dimension_numbers = #tpu.dot_dimension_numbers<[1], [1], [0], [0], [0, 0, 1, 0], [], []>} : vector<8x16xf32>, vector<8x16xf32>, vector<8x8xf32> -> vector<8x8xf32>
    %115 = vector.broadcast %91 : vector<1x8xf32> to vector<8x8xf32>
    %116 = arith.addf %114, %115 : vector<8x8xf32>
    %cst_35 = arith.constant dense<0xFF800000> : vector<8xf32>
    %117 = vector.multi_reduction <maximumf>, %116, %cst_35 [1] : vector<8x8xf32> to vector<8xf32>
    %118 = vector.shape_cast %117 : vector<8xf32> to vector<8x1xf32>
    %119 = vector.broadcast %118 : vector<8x1xf32> to vector<8x8xf32>
    %120 = arith.subf %116, %119 : vector<8x8xf32>
    %121 = math.exp %120 : vector<8x8xf32>
    %cst_36 = arith.constant dense<0.000000e+00> : vector<8xf32>
    %122 = vector.multi_reduction <add>, %121, %cst_36 [1] : vector<8x8xf32> to vector<8xf32>
    %123 = vector.shape_cast %122 : vector<8xf32> to vector<8x1xf32>
    %124 = tpu.reciprocal %123 {approx = true} : vector<8x1xf32> -> vector<8x1xf32>
    %125 = vector.broadcast %124 : vector<8x1xf32> to vector<8x8xf32>
    %126 = arith.mulf %121, %125 : vector<8x8xf32>
    %cst_37 = arith.constant dense<0.000000e+00> : vector<8x16xf32>
    %127 = tpu.matmul %126, %113, %cst_37 {dimension_numbers = #tpu.dot_dimension_numbers<[1], [0], [0], [1], [0, 0, 1, 1], [], []>} : vector<8x8xf32>, vector<8x16xf32>, vector<8x16xf32> -> vector<8x16xf32>
    %128 = vector.extract_strided_slice %50 {offsets = [16, 0], sizes = [16, 32], strides = [1, 1]} : vector<32x32xf32> to vector<16x32xf32>
    %cst_38 = arith.constant dense<0.000000e+00> : vector<8x32xf32>
    %129 = tpu.matmul %127, %128, %cst_38 {dimension_numbers = #tpu.dot_dimension_numbers<[1], [0], [0], [1], [0, 0, 1, 1], [], []>} : vector<8x16xf32>, vector<16x32xf32>, vector<8x32xf32> -> vector<8x32xf32>
    %130 = arith.addf %110, %129 : vector<8x32xf32>
    %131 = tpu.concatenate %90, %130 in 0 : vector<8x32xf32>, vector<8x32xf32> -> vector<16x32xf32>
    %c248 = arith.constant 248 : index
    %c0_39 = arith.constant 0 : index
    %132 = vector.load %arg2[%c248, %c0_39] : memref<704x128xf32, #tpu.memory_space<vmem>>, vector<1x32xf32>
    %133 = vector.broadcast %132 : vector<1x32xf32> to vector<16x32xf32>
    %134 = arith.addf %131, %133 : vector<16x32xf32>
    %135 = arith.addf %35, %134 : vector<16x32xf32>
    %c256 = arith.constant 256 : index
    %c0_40 = arith.constant 0 : index
    %136 = vector.load %arg2[%c256, %c0_40] : memref<704x128xf32, #tpu.memory_space<vmem>>, vector<1x32xf32>
    %c264 = arith.constant 264 : index
    %c0_41 = arith.constant 0 : index
    %137 = vector.load %arg2[%c264, %c0_41] : memref<704x128xf32, #tpu.memory_space<vmem>>, vector<1x32xf32>
    %cst_42 = arith.constant dense<0.000000e+00> : vector<16xf32>
    %138 = vector.multi_reduction <add>, %135, %cst_42 [1] : vector<16x32xf32> to vector<16xf32>
    %139 = vector.shape_cast %138 : vector<16xf32> to vector<16x1xf32>
    %cst_43 = arith.constant 3.200000e+01 : f32
    %140 = vector.broadcast %cst_43 : f32 to vector<16x1xf32>
    %141 = arith.divf %139, %140 : vector<16x1xf32>
    %142 = vector.broadcast %141 : vector<16x1xf32> to vector<16x32xf32>
    %143 = arith.subf %135, %142 : vector<16x32xf32>
    %144 = arith.mulf %143, %143 : vector<16x32xf32>
    %cst_44 = arith.constant dense<0.000000e+00> : vector<16xf32>
    %145 = vector.multi_reduction <add>, %144, %cst_44 [1] : vector<16x32xf32> to vector<16xf32>
    %146 = vector.shape_cast %145 : vector<16xf32> to vector<16x1xf32>
    %cst_45 = arith.constant 3.200000e+01 : f32
    %147 = vector.broadcast %cst_45 : f32 to vector<16x1xf32>
    %148 = arith.divf %146, %147 : vector<16x1xf32>
    %149 = vector.broadcast %141 : vector<16x1xf32> to vector<16x32xf32>
    %150 = arith.subf %135, %149 : vector<16x32xf32>
    %cst_46 = arith.constant 9.99999996E-13 : f32
    %151 = vector.broadcast %cst_46 : f32 to vector<16x1xf32>
    %152 = arith.addf %148, %151 : vector<16x1xf32>
    %153 = math.rsqrt %152 : vector<16x1xf32>
    %154 = vector.broadcast %153 : vector<16x1xf32> to vector<16x32xf32>
    %155 = arith.mulf %150, %154 : vector<16x32xf32>
    %156 = vector.broadcast %136 : vector<1x32xf32> to vector<16x32xf32>
    %157 = arith.mulf %155, %156 : vector<16x32xf32>
    %158 = vector.broadcast %137 : vector<1x32xf32> to vector<16x32xf32>
    %159 = arith.addf %157, %158 : vector<16x32xf32>
    %c272 = arith.constant 272 : index
    %c0_47 = arith.constant 0 : index
    %160 = vector.load %arg2[%c272, %c0_47] : memref<704x128xf32, #tpu.memory_space<vmem>>, vector<32x64xf32>
    %cst_48 = arith.constant dense<0.000000e+00> : vector<16x64xf32>
    %161 = tpu.matmul %159, %160, %cst_48 {dimension_numbers = #tpu.dot_dimension_numbers<[1], [0], [0], [1], [0, 0, 1, 1], [], []>} : vector<16x32xf32>, vector<32x64xf32>, vector<16x64xf32> -> vector<16x64xf32>
    %c304 = arith.constant 304 : index
    %c0_49 = arith.constant 0 : index
    %162 = vector.load %arg2[%c304, %c0_49] : memref<704x128xf32, #tpu.memory_space<vmem>>, vector<1x64xf32>
    %163 = vector.broadcast %162 : vector<1x64xf32> to vector<16x64xf32>
    %164 = arith.addf %161, %163 : vector<16x64xf32>
    %cst_50 = arith.constant 5.000000e-01 : f32
    %165 = vector.broadcast %cst_50 : f32 to vector<16x64xf32>
    %166 = arith.mulf %165, %164 : vector<16x64xf32>
    %cst_51 = arith.constant 4.471500e-02 : f32
    %167 = vector.broadcast %cst_51 : f32 to vector<16x64xf32>
    %168 = arith.mulf %167, %164 : vector<16x64xf32>
    %169 = arith.mulf %168, %164 : vector<16x64xf32>
    %170 = arith.mulf %169, %164 : vector<16x64xf32>
    %171 = arith.addf %164, %170 : vector<16x64xf32>
    %cst_52 = arith.constant 0.797884583 : f32
    %172 = vector.broadcast %cst_52 : f32 to vector<16x64xf32>
    %173 = arith.mulf %172, %171 : vector<16x64xf32>
    %174 = math.tanh %173 : vector<16x64xf32>
    %cst_53 = arith.constant 1.000000e+00 : f32
    %175 = vector.broadcast %cst_53 : f32 to vector<16x64xf32>
    %176 = arith.addf %175, %174 : vector<16x64xf32>
    %177 = arith.mulf %166, %176 : vector<16x64xf32>
    %c312 = arith.constant 312 : index
    %c0_54 = arith.constant 0 : index
    %178 = vector.load %arg2[%c312, %c0_54] : memref<704x128xf32, #tpu.memory_space<vmem>>, vector<64x32xf32>
    %cst_55 = arith.constant dense<0.000000e+00> : vector<16x32xf32>
    %179 = tpu.matmul %177, %178, %cst_55 {dimension_numbers = #tpu.dot_dimension_numbers<[1], [0], [0], [1], [0, 0, 1, 1], [], []>} : vector<16x64xf32>, vector<64x32xf32>, vector<16x32xf32> -> vector<16x32xf32>
    %c376 = arith.constant 376 : index
    %c0_56 = arith.constant 0 : index
    %180 = vector.load %arg2[%c376, %c0_56] : memref<704x128xf32, #tpu.memory_space<vmem>>, vector<1x32xf32>
    %181 = vector.broadcast %180 : vector<1x32xf32> to vector<16x32xf32>
    %182 = arith.addf %179, %181 : vector<16x32xf32>
    %183 = arith.addf %159, %182 : vector<16x32xf32>
    %c384 = arith.constant 384 : index
    %c0_57 = arith.constant 0 : index
    %184 = vector.load %arg2[%c384, %c0_57] : memref<704x128xf32, #tpu.memory_space<vmem>>, vector<1x32xf32>
    %c392 = arith.constant 392 : index
    %c0_58 = arith.constant 0 : index
    %185 = vector.load %arg2[%c392, %c0_58] : memref<704x128xf32, #tpu.memory_space<vmem>>, vector<1x32xf32>
    %cst_59 = arith.constant dense<0.000000e+00> : vector<16xf32>
    %186 = vector.multi_reduction <add>, %183, %cst_59 [1] : vector<16x32xf32> to vector<16xf32>
    %187 = vector.shape_cast %186 : vector<16xf32> to vector<16x1xf32>
    %cst_60 = arith.constant 3.200000e+01 : f32
    %188 = vector.broadcast %cst_60 : f32 to vector<16x1xf32>
    %189 = arith.divf %187, %188 : vector<16x1xf32>
    %190 = vector.broadcast %189 : vector<16x1xf32> to vector<16x32xf32>
    %191 = arith.subf %183, %190 : vector<16x32xf32>
    %192 = arith.mulf %191, %191 : vector<16x32xf32>
    %cst_61 = arith.constant dense<0.000000e+00> : vector<16xf32>
    %193 = vector.multi_reduction <add>, %192, %cst_61 [1] : vector<16x32xf32> to vector<16xf32>
    %194 = vector.shape_cast %193 : vector<16xf32> to vector<16x1xf32>
    %cst_62 = arith.constant 3.200000e+01 : f32
    %195 = vector.broadcast %cst_62 : f32 to vector<16x1xf32>
    %196 = arith.divf %194, %195 : vector<16x1xf32>
    %197 = vector.broadcast %189 : vector<16x1xf32> to vector<16x32xf32>
    %198 = arith.subf %183, %197 : vector<16x32xf32>
    %cst_63 = arith.constant 9.99999996E-13 : f32
    %199 = vector.broadcast %cst_63 : f32 to vector<16x1xf32>
    %200 = arith.addf %196, %199 : vector<16x1xf32>
    %201 = math.rsqrt %200 : vector<16x1xf32>
    %202 = vector.broadcast %201 : vector<16x1xf32> to vector<16x32xf32>
    %203 = arith.mulf %198, %202 : vector<16x32xf32>
    %204 = vector.broadcast %184 : vector<1x32xf32> to vector<16x32xf32>
    %205 = arith.mulf %203, %204 : vector<16x32xf32>
    %206 = vector.broadcast %185 : vector<1x32xf32> to vector<16x32xf32>
    %207 = arith.addf %205, %206 : vector<16x32xf32>
    %c400 = arith.constant 400 : index
    %c0_64 = arith.constant 0 : index
    %208 = vector.load %arg2[%c400, %c0_64] : memref<704x128xf32, #tpu.memory_space<vmem>>, vector<32x96xf32>
    %cst_65 = arith.constant dense<0.000000e+00> : vector<16x96xf32>
    %209 = tpu.matmul %207, %208, %cst_65 {dimension_numbers = #tpu.dot_dimension_numbers<[1], [0], [0], [1], [0, 0, 1, 1], [], []>} : vector<16x32xf32>, vector<32x96xf32>, vector<16x96xf32> -> vector<16x96xf32>
    %c432 = arith.constant 432 : index
    %c0_66 = arith.constant 0 : index
    %210 = vector.load %arg2[%c432, %c0_66] : memref<704x128xf32, #tpu.memory_space<vmem>>, vector<1x96xf32>
    %211 = vector.broadcast %210 : vector<1x96xf32> to vector<16x96xf32>
    %212 = arith.addf %209, %211 : vector<16x96xf32>
    %213 = vector.extract_strided_slice %212 {offsets = [0, 0], sizes = [16, 32], strides = [1, 1]} : vector<16x96xf32> to vector<16x32xf32>
    %214 = vector.extract_strided_slice %212 {offsets = [0, 32], sizes = [16, 32], strides = [1, 1]} : vector<16x96xf32> to vector<16x32xf32>
    %215 = vector.extract_strided_slice %212 {offsets = [0, 64], sizes = [16, 32], strides = [1, 1]} : vector<16x96xf32> to vector<16x32xf32>
    %c440 = arith.constant 440 : index
    %c0_67 = arith.constant 0 : index
    %216 = vector.load %arg2[%c440, %c0_67] : memref<704x128xf32, #tpu.memory_space<vmem>>, vector<32x32xf32>
    %217 = vector.extract_strided_slice %41 {offsets = [0, 0], sizes = [1, 8], strides = [1, 1]} : vector<2x8xf32> to vector<1x8xf32>
    %218 = vector.extract_strided_slice %213 {offsets = [0, 0], sizes = [8, 16], strides = [1, 1]} : vector<16x32xf32> to vector<8x16xf32>
    %219 = vector.extract_strided_slice %214 {offsets = [0, 0], sizes = [8, 16], strides = [1, 1]} : vector<16x32xf32> to vector<8x16xf32>
    %220 = vector.extract_strided_slice %215 {offsets = [0, 0], sizes = [8, 16], strides = [1, 1]} : vector<16x32xf32> to vector<8x16xf32>
    %cst_68 = arith.constant dense<0.000000e+00> : vector<8x8xf32>
    %221 = tpu.matmul %218, %219, %cst_68 {dimension_numbers = #tpu.dot_dimension_numbers<[1], [1], [0], [0], [0, 0, 1, 0], [], []>} : vector<8x16xf32>, vector<8x16xf32>, vector<8x8xf32> -> vector<8x8xf32>
    %222 = vector.broadcast %217 : vector<1x8xf32> to vector<8x8xf32>
    %223 = arith.addf %221, %222 : vector<8x8xf32>
    %cst_69 = arith.constant dense<0xFF800000> : vector<8xf32>
    %224 = vector.multi_reduction <maximumf>, %223, %cst_69 [1] : vector<8x8xf32> to vector<8xf32>
    %225 = vector.shape_cast %224 : vector<8xf32> to vector<8x1xf32>
    %226 = vector.broadcast %225 : vector<8x1xf32> to vector<8x8xf32>
    %227 = arith.subf %223, %226 : vector<8x8xf32>
    %228 = math.exp %227 : vector<8x8xf32>
    %cst_70 = arith.constant dense<0.000000e+00> : vector<8xf32>
    %229 = vector.multi_reduction <add>, %228, %cst_70 [1] : vector<8x8xf32> to vector<8xf32>
    %230 = vector.shape_cast %229 : vector<8xf32> to vector<8x1xf32>
    %231 = tpu.reciprocal %230 {approx = true} : vector<8x1xf32> -> vector<8x1xf32>
    %232 = vector.broadcast %231 : vector<8x1xf32> to vector<8x8xf32>
    %233 = arith.mulf %228, %232 : vector<8x8xf32>
    %cst_71 = arith.constant dense<0.000000e+00> : vector<8x16xf32>
    %234 = tpu.matmul %233, %220, %cst_71 {dimension_numbers = #tpu.dot_dimension_numbers<[1], [0], [0], [1], [0, 0, 1, 1], [], []>} : vector<8x8xf32>, vector<8x16xf32>, vector<8x16xf32> -> vector<8x16xf32>
    %235 = vector.extract_strided_slice %216 {offsets = [0, 0], sizes = [16, 32], strides = [1, 1]} : vector<32x32xf32> to vector<16x32xf32>
    %cst_72 = arith.constant dense<0.000000e+00> : vector<8x32xf32>
    %236 = tpu.matmul %234, %235, %cst_72 {dimension_numbers = #tpu.dot_dimension_numbers<[1], [0], [0], [1], [0, 0, 1, 1], [], []>} : vector<8x16xf32>, vector<16x32xf32>, vector<8x32xf32> -> vector<8x32xf32>
    %237 = vector.extract_strided_slice %213 {offsets = [0, 16], sizes = [8, 16], strides = [1, 1]} : vector<16x32xf32> to vector<8x16xf32>
    %238 = vector.extract_strided_slice %214 {offsets = [0, 16], sizes = [8, 16], strides = [1, 1]} : vector<16x32xf32> to vector<8x16xf32>
    %239 = vector.extract_strided_slice %215 {offsets = [0, 16], sizes = [8, 16], strides = [1, 1]} : vector<16x32xf32> to vector<8x16xf32>
    %cst_73 = arith.constant dense<0.000000e+00> : vector<8x8xf32>
    %240 = tpu.matmul %237, %238, %cst_73 {dimension_numbers = #tpu.dot_dimension_numbers<[1], [1], [0], [0], [0, 0, 1, 0], [], []>} : vector<8x16xf32>, vector<8x16xf32>, vector<8x8xf32> -> vector<8x8xf32>
    %241 = vector.broadcast %217 : vector<1x8xf32> to vector<8x8xf32>
    %242 = arith.addf %240, %241 : vector<8x8xf32>
    %cst_74 = arith.constant dense<0xFF800000> : vector<8xf32>
    %243 = vector.multi_reduction <maximumf>, %242, %cst_74 [1] : vector<8x8xf32> to vector<8xf32>
    %244 = vector.shape_cast %243 : vector<8xf32> to vector<8x1xf32>
    %245 = vector.broadcast %244 : vector<8x1xf32> to vector<8x8xf32>
    %246 = arith.subf %242, %245 : vector<8x8xf32>
    %247 = math.exp %246 : vector<8x8xf32>
    %cst_75 = arith.constant dense<0.000000e+00> : vector<8xf32>
    %248 = vector.multi_reduction <add>, %247, %cst_75 [1] : vector<8x8xf32> to vector<8xf32>
    %249 = vector.shape_cast %248 : vector<8xf32> to vector<8x1xf32>
    %250 = tpu.reciprocal %249 {approx = true} : vector<8x1xf32> -> vector<8x1xf32>
    %251 = vector.broadcast %250 : vector<8x1xf32> to vector<8x8xf32>
    %252 = arith.mulf %247, %251 : vector<8x8xf32>
    %cst_76 = arith.constant dense<0.000000e+00> : vector<8x16xf32>
    %253 = tpu.matmul %252, %239, %cst_76 {dimension_numbers = #tpu.dot_dimension_numbers<[1], [0], [0], [1], [0, 0, 1, 1], [], []>} : vector<8x8xf32>, vector<8x16xf32>, vector<8x16xf32> -> vector<8x16xf32>
    %254 = vector.extract_strided_slice %216 {offsets = [16, 0], sizes = [16, 32], strides = [1, 1]} : vector<32x32xf32> to vector<16x32xf32>
    %cst_77 = arith.constant dense<0.000000e+00> : vector<8x32xf32>
    %255 = tpu.matmul %253, %254, %cst_77 {dimension_numbers = #tpu.dot_dimension_numbers<[1], [0], [0], [1], [0, 0, 1, 1], [], []>} : vector<8x16xf32>, vector<16x32xf32>, vector<8x32xf32> -> vector<8x32xf32>
    %256 = arith.addf %236, %255 : vector<8x32xf32>
    %257 = vector.extract_strided_slice %41 {offsets = [1, 0], sizes = [1, 8], strides = [1, 1]} : vector<2x8xf32> to vector<1x8xf32>
    %258 = vector.extract_strided_slice %213 {offsets = [8, 0], sizes = [8, 16], strides = [1, 1]} : vector<16x32xf32> to vector<8x16xf32>
    %259 = vector.extract_strided_slice %214 {offsets = [8, 0], sizes = [8, 16], strides = [1, 1]} : vector<16x32xf32> to vector<8x16xf32>
    %260 = vector.extract_strided_slice %215 {offsets = [8, 0], sizes = [8, 16], strides = [1, 1]} : vector<16x32xf32> to vector<8x16xf32>
    %cst_78 = arith.constant dense<0.000000e+00> : vector<8x8xf32>
    %261 = tpu.matmul %258, %259, %cst_78 {dimension_numbers = #tpu.dot_dimension_numbers<[1], [1], [0], [0], [0, 0, 1, 0], [], []>} : vector<8x16xf32>, vector<8x16xf32>, vector<8x8xf32> -> vector<8x8xf32>
    %262 = vector.broadcast %257 : vector<1x8xf32> to vector<8x8xf32>
    %263 = arith.addf %261, %262 : vector<8x8xf32>
    %cst_79 = arith.constant dense<0xFF800000> : vector<8xf32>
    %264 = vector.multi_reduction <maximumf>, %263, %cst_79 [1] : vector<8x8xf32> to vector<8xf32>
    %265 = vector.shape_cast %264 : vector<8xf32> to vector<8x1xf32>
    %266 = vector.broadcast %265 : vector<8x1xf32> to vector<8x8xf32>
    %267 = arith.subf %263, %266 : vector<8x8xf32>
    %268 = math.exp %267 : vector<8x8xf32>
    %cst_80 = arith.constant dense<0.000000e+00> : vector<8xf32>
    %269 = vector.multi_reduction <add>, %268, %cst_80 [1] : vector<8x8xf32> to vector<8xf32>
    %270 = vector.shape_cast %269 : vector<8xf32> to vector<8x1xf32>
    %271 = tpu.reciprocal %270 {approx = true} : vector<8x1xf32> -> vector<8x1xf32>
    %272 = vector.broadcast %271 : vector<8x1xf32> to vector<8x8xf32>
    %273 = arith.mulf %268, %272 : vector<8x8xf32>
    %cst_81 = arith.constant dense<0.000000e+00> : vector<8x16xf32>
    %274 = tpu.matmul %273, %260, %cst_81 {dimension_numbers = #tpu.dot_dimension_numbers<[1], [0], [0], [1], [0, 0, 1, 1], [], []>} : vector<8x8xf32>, vector<8x16xf32>, vector<8x16xf32> -> vector<8x16xf32>
    %275 = vector.extract_strided_slice %216 {offsets = [0, 0], sizes = [16, 32], strides = [1, 1]} : vector<32x32xf32> to vector<16x32xf32>
    %cst_82 = arith.constant dense<0.000000e+00> : vector<8x32xf32>
    %276 = tpu.matmul %274, %275, %cst_82 {dimension_numbers = #tpu.dot_dimension_numbers<[1], [0], [0], [1], [0, 0, 1, 1], [], []>} : vector<8x16xf32>, vector<16x32xf32>, vector<8x32xf32> -> vector<8x32xf32>
    %277 = vector.extract_strided_slice %213 {offsets = [8, 16], sizes = [8, 16], strides = [1, 1]} : vector<16x32xf32> to vector<8x16xf32>
    %278 = vector.extract_strided_slice %214 {offsets = [8, 16], sizes = [8, 16], strides = [1, 1]} : vector<16x32xf32> to vector<8x16xf32>
    %279 = vector.extract_strided_slice %215 {offsets = [8, 16], sizes = [8, 16], strides = [1, 1]} : vector<16x32xf32> to vector<8x16xf32>
    %cst_83 = arith.constant dense<0.000000e+00> : vector<8x8xf32>
    %280 = tpu.matmul %277, %278, %cst_83 {dimension_numbers = #tpu.dot_dimension_numbers<[1], [1], [0], [0], [0, 0, 1, 0], [], []>} : vector<8x16xf32>, vector<8x16xf32>, vector<8x8xf32> -> vector<8x8xf32>
    %281 = vector.broadcast %257 : vector<1x8xf32> to vector<8x8xf32>
    %282 = arith.addf %280, %281 : vector<8x8xf32>
    %cst_84 = arith.constant dense<0xFF800000> : vector<8xf32>
    %283 = vector.multi_reduction <maximumf>, %282, %cst_84 [1] : vector<8x8xf32> to vector<8xf32>
    %284 = vector.shape_cast %283 : vector<8xf32> to vector<8x1xf32>
    %285 = vector.broadcast %284 : vector<8x1xf32> to vector<8x8xf32>
    %286 = arith.subf %282, %285 : vector<8x8xf32>
    %287 = math.exp %286 : vector<8x8xf32>
    %cst_85 = arith.constant dense<0.000000e+00> : vector<8xf32>
    %288 = vector.multi_reduction <add>, %287, %cst_85 [1] : vector<8x8xf32> to vector<8xf32>
    %289 = vector.shape_cast %288 : vector<8xf32> to vector<8x1xf32>
    %290 = tpu.reciprocal %289 {approx = true} : vector<8x1xf32> -> vector<8x1xf32>
    %291 = vector.broadcast %290 : vector<8x1xf32> to vector<8x8xf32>
    %292 = arith.mulf %287, %291 : vector<8x8xf32>
    %cst_86 = arith.constant dense<0.000000e+00> : vector<8x16xf32>
    %293 = tpu.matmul %292, %279, %cst_86 {dimension_numbers = #tpu.dot_dimension_numbers<[1], [0], [0], [1], [0, 0, 1, 1], [], []>} : vector<8x8xf32>, vector<8x16xf32>, vector<8x16xf32> -> vector<8x16xf32>
    %294 = vector.extract_strided_slice %216 {offsets = [16, 0], sizes = [16, 32], strides = [1, 1]} : vector<32x32xf32> to vector<16x32xf32>
    %cst_87 = arith.constant dense<0.000000e+00> : vector<8x32xf32>
    %295 = tpu.matmul %293, %294, %cst_87 {dimension_numbers = #tpu.dot_dimension_numbers<[1], [0], [0], [1], [0, 0, 1, 1], [], []>} : vector<8x16xf32>, vector<16x32xf32>, vector<8x32xf32> -> vector<8x32xf32>
    %296 = arith.addf %276, %295 : vector<8x32xf32>
    %297 = tpu.concatenate %256, %296 in 0 : vector<8x32xf32>, vector<8x32xf32> -> vector<16x32xf32>
    %c472 = arith.constant 472 : index
    %c0_88 = arith.constant 0 : index
    %298 = vector.load %arg2[%c472, %c0_88] : memref<704x128xf32, #tpu.memory_space<vmem>>, vector<1x32xf32>
    %299 = vector.broadcast %298 : vector<1x32xf32> to vector<16x32xf32>
    %300 = arith.addf %297, %299 : vector<16x32xf32>
    %301 = arith.addf %207, %300 : vector<16x32xf32>
    %c480 = arith.constant 480 : index
    %c0_89 = arith.constant 0 : index
    %302 = vector.load %arg2[%c480, %c0_89] : memref<704x128xf32, #tpu.memory_space<vmem>>, vector<1x32xf32>
    %c488 = arith.constant 488 : index
    %c0_90 = arith.constant 0 : index
    %303 = vector.load %arg2[%c488, %c0_90] : memref<704x128xf32, #tpu.memory_space<vmem>>, vector<1x32xf32>
    %cst_91 = arith.constant dense<0.000000e+00> : vector<16xf32>
    %304 = vector.multi_reduction <add>, %301, %cst_91 [1] : vector<16x32xf32> to vector<16xf32>
    %305 = vector.shape_cast %304 : vector<16xf32> to vector<16x1xf32>
    %cst_92 = arith.constant 3.200000e+01 : f32
    %306 = vector.broadcast %cst_92 : f32 to vector<16x1xf32>
    %307 = arith.divf %305, %306 : vector<16x1xf32>
    %308 = vector.broadcast %307 : vector<16x1xf32> to vector<16x32xf32>
    %309 = arith.subf %301, %308 : vector<16x32xf32>
    %310 = arith.mulf %309, %309 : vector<16x32xf32>
    %cst_93 = arith.constant dense<0.000000e+00> : vector<16xf32>
    %311 = vector.multi_reduction <add>, %310, %cst_93 [1] : vector<16x32xf32> to vector<16xf32>
    %312 = vector.shape_cast %311 : vector<16xf32> to vector<16x1xf32>
    %cst_94 = arith.constant 3.200000e+01 : f32
    %313 = vector.broadcast %cst_94 : f32 to vector<16x1xf32>
    %314 = arith.divf %312, %313 : vector<16x1xf32>
    %315 = vector.broadcast %307 : vector<16x1xf32> to vector<16x32xf32>
    %316 = arith.subf %301, %315 : vector<16x32xf32>
    %cst_95 = arith.constant 9.99999996E-13 : f32
    %317 = vector.broadcast %cst_95 : f32 to vector<16x1xf32>
    %318 = arith.addf %314, %317 : vector<16x1xf32>
    %319 = math.rsqrt %318 : vector<16x1xf32>
    %320 = vector.broadcast %319 : vector<16x1xf32> to vector<16x32xf32>
    %321 = arith.mulf %316, %320 : vector<16x32xf32>
    %322 = vector.broadcast %302 : vector<1x32xf32> to vector<16x32xf32>
    %323 = arith.mulf %321, %322 : vector<16x32xf32>
    %324 = vector.broadcast %303 : vector<1x32xf32> to vector<16x32xf32>
    %325 = arith.addf %323, %324 : vector<16x32xf32>
    %c496 = arith.constant 496 : index
    %c0_96 = arith.constant 0 : index
    %326 = vector.load %arg2[%c496, %c0_96] : memref<704x128xf32, #tpu.memory_space<vmem>>, vector<32x64xf32>
    %cst_97 = arith.constant dense<0.000000e+00> : vector<16x64xf32>
    %327 = tpu.matmul %325, %326, %cst_97 {dimension_numbers = #tpu.dot_dimension_numbers<[1], [0], [0], [1], [0, 0, 1, 1], [], []>} : vector<16x32xf32>, vector<32x64xf32>, vector<16x64xf32> -> vector<16x64xf32>
    %c528 = arith.constant 528 : index
    %c0_98 = arith.constant 0 : index
    %328 = vector.load %arg2[%c528, %c0_98] : memref<704x128xf32, #tpu.memory_space<vmem>>, vector<1x64xf32>
    %329 = vector.broadcast %328 : vector<1x64xf32> to vector<16x64xf32>
    %330 = arith.addf %327, %329 : vector<16x64xf32>
    %cst_99 = arith.constant 5.000000e-01 : f32
    %331 = vector.broadcast %cst_99 : f32 to vector<16x64xf32>
    %332 = arith.mulf %331, %330 : vector<16x64xf32>
    %cst_100 = arith.constant 4.471500e-02 : f32
    %333 = vector.broadcast %cst_100 : f32 to vector<16x64xf32>
    %334 = arith.mulf %333, %330 : vector<16x64xf32>
    %335 = arith.mulf %334, %330 : vector<16x64xf32>
    %336 = arith.mulf %335, %330 : vector<16x64xf32>
    %337 = arith.addf %330, %336 : vector<16x64xf32>
    %cst_101 = arith.constant 0.797884583 : f32
    %338 = vector.broadcast %cst_101 : f32 to vector<16x64xf32>
    %339 = arith.mulf %338, %337 : vector<16x64xf32>
    %340 = math.tanh %339 : vector<16x64xf32>
    %cst_102 = arith.constant 1.000000e+00 : f32
    %341 = vector.broadcast %cst_102 : f32 to vector<16x64xf32>
    %342 = arith.addf %341, %340 : vector<16x64xf32>
    %343 = arith.mulf %332, %342 : vector<16x64xf32>
    %c536 = arith.constant 536 : index
    %c0_103 = arith.constant 0 : index
    %344 = vector.load %arg2[%c536, %c0_103] : memref<704x128xf32, #tpu.memory_space<vmem>>, vector<64x32xf32>
    %cst_104 = arith.constant dense<0.000000e+00> : vector<16x32xf32>
    %345 = tpu.matmul %343, %344, %cst_104 {dimension_numbers = #tpu.dot_dimension_numbers<[1], [0], [0], [1], [0, 0, 1, 1], [], []>} : vector<16x64xf32>, vector<64x32xf32>, vector<16x32xf32> -> vector<16x32xf32>
    %c600 = arith.constant 600 : index
    %c0_105 = arith.constant 0 : index
    %346 = vector.load %arg2[%c600, %c0_105] : memref<704x128xf32, #tpu.memory_space<vmem>>, vector<1x32xf32>
    %347 = vector.broadcast %346 : vector<1x32xf32> to vector<16x32xf32>
    %348 = arith.addf %345, %347 : vector<16x32xf32>
    %349 = arith.addf %325, %348 : vector<16x32xf32>
    %c608 = arith.constant 608 : index
    %c0_106 = arith.constant 0 : index
    %350 = vector.load %arg2[%c608, %c0_106] : memref<704x128xf32, #tpu.memory_space<vmem>>, vector<1x32xf32>
    %c616 = arith.constant 616 : index
    %c0_107 = arith.constant 0 : index
    %351 = vector.load %arg2[%c616, %c0_107] : memref<704x128xf32, #tpu.memory_space<vmem>>, vector<1x32xf32>
    %cst_108 = arith.constant dense<0.000000e+00> : vector<16xf32>
    %352 = vector.multi_reduction <add>, %349, %cst_108 [1] : vector<16x32xf32> to vector<16xf32>
    %353 = vector.shape_cast %352 : vector<16xf32> to vector<16x1xf32>
    %cst_109 = arith.constant 3.200000e+01 : f32
    %354 = vector.broadcast %cst_109 : f32 to vector<16x1xf32>
    %355 = arith.divf %353, %354 : vector<16x1xf32>
    %356 = vector.broadcast %355 : vector<16x1xf32> to vector<16x32xf32>
    %357 = arith.subf %349, %356 : vector<16x32xf32>
    %358 = arith.mulf %357, %357 : vector<16x32xf32>
    %cst_110 = arith.constant dense<0.000000e+00> : vector<16xf32>
    %359 = vector.multi_reduction <add>, %358, %cst_110 [1] : vector<16x32xf32> to vector<16xf32>
    %360 = vector.shape_cast %359 : vector<16xf32> to vector<16x1xf32>
    %cst_111 = arith.constant 3.200000e+01 : f32
    %361 = vector.broadcast %cst_111 : f32 to vector<16x1xf32>
    %362 = arith.divf %360, %361 : vector<16x1xf32>
    %363 = vector.broadcast %355 : vector<16x1xf32> to vector<16x32xf32>
    %364 = arith.subf %349, %363 : vector<16x32xf32>
    %cst_112 = arith.constant 9.99999996E-13 : f32
    %365 = vector.broadcast %cst_112 : f32 to vector<16x1xf32>
    %366 = arith.addf %362, %365 : vector<16x1xf32>
    %367 = math.rsqrt %366 : vector<16x1xf32>
    %368 = vector.broadcast %367 : vector<16x1xf32> to vector<16x32xf32>
    %369 = arith.mulf %364, %368 : vector<16x32xf32>
    %370 = vector.broadcast %350 : vector<1x32xf32> to vector<16x32xf32>
    %371 = arith.mulf %369, %370 : vector<16x32xf32>
    %372 = vector.broadcast %351 : vector<1x32xf32> to vector<16x32xf32>
    %373 = arith.addf %371, %372 : vector<16x32xf32>
    %374 = vector.extract_strided_slice %373 {offsets = [0, 0], sizes = [1, 32], strides = [1, 1]} : vector<16x32xf32> to vector<1x32xf32>
    %375 = vector.extract_strided_slice %373 {offsets = [8, 0], sizes = [1, 32], strides = [1, 1]} : vector<16x32xf32> to vector<1x32xf32>
    %376 = tpu.concatenate %374, %375 in 0 : vector<1x32xf32>, vector<1x32xf32> -> vector<2x32xf32>
    %c624 = arith.constant 624 : index
    %c0_113 = arith.constant 0 : index
    %377 = vector.load %arg2[%c624, %c0_113] : memref<704x128xf32, #tpu.memory_space<vmem>>, vector<32x32xf32>
    %cst_114 = arith.constant dense<0.000000e+00> : vector<2x32xf32>
    %378 = tpu.matmul %376, %377, %cst_114 {dimension_numbers = #tpu.dot_dimension_numbers<[1], [0], [0], [1], [0, 0, 1, 1], [], []>} : vector<2x32xf32>, vector<32x32xf32>, vector<2x32xf32> -> vector<2x32xf32>
    %c656 = arith.constant 656 : index
    %c0_115 = arith.constant 0 : index
    %379 = vector.load %arg2[%c656, %c0_115] : memref<704x128xf32, #tpu.memory_space<vmem>>, vector<1x32xf32>
    %380 = vector.broadcast %379 : vector<1x32xf32> to vector<2x32xf32>
    %381 = arith.addf %378, %380 : vector<2x32xf32>
    %382 = math.tanh %381 : vector<2x32xf32>
    %c664 = arith.constant 664 : index
    %c0_116 = arith.constant 0 : index
    %383 = vector.load %arg2[%c664, %c0_116] : memref<704x128xf32, #tpu.memory_space<vmem>>, vector<32x2xf32>
    %cst_117 = arith.constant dense<0.000000e+00> : vector<2x2xf32>
    %384 = tpu.matmul %382, %383, %cst_117 {dimension_numbers = #tpu.dot_dimension_numbers<[1], [0], [0], [1], [0, 0, 1, 1], [], []>} : vector<2x32xf32>, vector<32x2xf32>, vector<2x2xf32> -> vector<2x2xf32>
    %c696 = arith.constant 696 : index
    %c0_118 = arith.constant 0 : index
    %385 = vector.load %arg2[%c696, %c0_118] : memref<704x128xf32, #tpu.memory_space<vmem>>, vector<1x2xf32>
    %386 = vector.broadcast %385 : vector<1x2xf32> to vector<2x2xf32>
    %387 = arith.addf %384, %386 : vector<2x2xf32>
    %c0_119 = arith.constant 0 : index
    %c0_120 = arith.constant 0 : index
    %388 = vector.load %arg3[%c0_119, %c0_120] : memref<2x2xf32, #tpu.memory_space<vmem>>, vector<2x2xf32>
    tpu.vector_store %arg3[%c0_119, %c0_120], %387 {strides = array<i32>} : memref<2x2xf32, #tpu.memory_space<vmem>>, vector<2x2xf32>,
    return
  }
}

</mosaic_0001>

<bundles_post_ra>
// kernel: sentiment_analyzer.1
= control target key start
LH: loop header
LB: loop body
LE: loop exit
PB: predicated region body
PF: predicated region fallthrough
CT: control target
= control target key end

     0   :  { %8 = vsyncpa [#allocation3], 0  ;;  %s3968_s0 = inlined_call_operand.vmem [shape: s32[16,1], index: 0, kind: input, shape index: {}]   ;;  %s3969_s1 = inlined_call_operand.vmem [shape: s32[2,8], index: 1, kind: input, shape index: {}]   ;;  %s3970_s2 = inlined_call_operand.hbm [shape: f32[704,128], index: 2, kind: input, shape index: {}]   ;;  %s3971_s3 = inlined_call_operand.hbm [shape: f32[2,2], index: 3, kind: output, shape index: {}]  }
   0x1   :  { %9 = vsyncpa [#allocation4], 0  ;;  %s3648_s12 = smov [#allocation2]  }
   0x2   :  { %s19_s13 = sshll.u32 %s3648_s12, 4  ;;  %s20_s13 = int_to_ptr.vmem [resolvable:$true] %s19_s13 }
   0x3   :  { %s3612_s14 = scalar_lea.vmem %s20_s13, 11264  ;;  %p3617_p1 = scmp.lt.s32.totalorder %s20_s13, %s20_s13 }
   0x4   :  { %p3613_p0 = scmp.ne.s32.totalorder %s20_s13, %s3612_s14  ;;  %p3618_p2 = scmp.lt.s32.totalorder %s3612_s14, %s3612_s14 }
   0x6   :  { %p3619_p3 = por %p3618_p2, %p3617_p1 }
   0x8   :  { %p3620_p4 = pnand %p3619_p3, %p3613_p0 }
   0xa   :  { %3623 = shalt.err (!%p3620_p4)
}
   0xb   :  { %s3649_s15 = smov 128   ;;  %s3650_s16 = smov 8  }
   0xc   :  { %25 = dma.hbm_to_vmem [thread:$0]  %s3970_s2, 11264, %s20_s13, [#allocation3], %s3649_s15, %s3649_s15, %s3650_s16  }
   0xd   :  { %3644 = dma.done.wait [#allocation3], 11264  }
   0xe   :  { %3645 = vsyncadd [#allocation3], 4294956032  ;;  %v3651_v0 = vmov 0   ;;  %v29_v1 = vld [vmem:[%s3968_s0] sm:$0xff]  ;;  %v60_v2 = vld [vmem:[#allocation2 + $0x78] sm:$0xff]  ;;  %v31_v19 = vlaneseq  ;;  %v3652_v22 = vmov 1.0  }
   0xf   :  { %3541 = vset.pattern.permute.xlu0 %v3651_v0  ;;  %3253 = vmatprep.subr.mxu0 %v60_v2  ;;  %v59_v3 = vld [vmem:[#allocation2 + $0x70] sm:$0xff]  ;;  %v30_v4 = vld [vmem:[%s3968_s0 + $0x8] sm:$0xff]  ;;  %v57_v6 = vld [vmem:[#allocation2 + $0x60] sm:$0xff]  ;;  %vm139_vm2 = vcmask 261120   ;;  %v3653_v61 = vmov 0.0   ;;  %vm3654_vm3 = vmmov 0  }
  0x10   :  { %34 = vperm.xlu0 %3541, %v29_v1   ;;  %3254 = vmatpush3.msra.mxu0 %v60_v2  ;;  %v58_v5 = vld [vmem:[#allocation2 + $0x68] sm:$0xff]  ;;  %v56_v7 = vld [vmem:[#allocation2 + $0x58] sm:$0xff]  ;;  %v55_v8 = vld [vmem:[#allocation2 + $0x50] sm:$0xff]  ;;  %v32_v20 = vand.u32 127, %v31_v19  ;;  %s3655_s0 = smov 64   ;;  %s3656_s2 = smov 96  }
  0x11   :  { %3255 = vmatprep.subr.mxu0 %v59_v3  ;;  %v54_v9 = vld [vmem:[#allocation2 + $0x48] sm:$0xff]  ;;  %v53_v10 = vld [vmem:[#allocation2 + $0x40] sm:$0xff]  ;;  %v52_v11 = vld [vmem:[#allocation2 + $0x38] sm:$0xff]  ;;  %vm284_vm4 = vcmask 130048   ;;  %vm359_vm5 = vcmask 64512   ;;  %s3658_s25 = smov 80  }
  0x12   :  { %3256 = vmatpush3.msra.mxu0 %v59_v3  ;;  %v51_v12 = vld [vmem:[#allocation2 + $0x30] sm:$0xff]  ;;  %v50_v13 = vld [vmem:[#allocation2 + $0x28] sm:$0xff]  ;;  %v49_v14 = vld [vmem:[#allocation2 + $0x20] sm:$0xff]  ;;  %s3659_s26 = smov 48   ;;  %vm1407_vm6 = vcmask 523264   ;;  %vm2871_vm7 = vcmask 1040384  }
  0x13   :  { %3257 = vmatprep.subr.mxu0 %v58_v5  ;;  %v48_v15 = vld [vmem:[#allocation2 + $0x18] sm:$0xff]  ;;  %v47_v16 = vld [vmem:[#allocation2 + $0x10] sm:$0xff]  ;;  %v46_v17 = vld [vmem:[#allocation2 + $0x8] sm:$0xff]  ;;  %s3660_s27 = smov [#allocation5]   ;;  %vm3038_vm8 = vcmask 9216  }
  0x14   :  { %37 = vperm.xlu0 %3541, %v30_v4   ;;  %3258 = vmatpush3.msra.mxu0 %v58_v5  ;;  %v45_v18 = vld [vmem:[#allocation2] sm:$0xff]  ;;  %v186_v41 = vld [vmem:[#allocation2 + $0xc8] sm:$0xff]  ;;  %v184_v43 = vld [vmem:[#allocation2 + $0xb8] sm:$0xff]  ;;  %s3046_s28 = sshll.u32 %s3660_s27, 4  ;;  %s3047_s28 = int_to_ptr.vmem [resolvable:$true] %s3046_s28 }
  0x15   :  { %3259 = vmatprep.subr.mxu0 %v57_v6  ;;  %v61_v25 = vld [vmem:[#allocation2 + $0x80] sm:$0xff]  ;;  %3288 = vmatprep.subr.mxu1 %v186_v41  ;;  %v183_v44 = vld [vmem:[#allocation2 + $0xb0] sm:$0xff]  ;;  %v3060_v54 = vld [vmem:[#allocation2 + $0xa8] ss:$0 sm:$0xff]  ;;  %s3624_s29 = scalar_lea.vmem %s3047_s28, 32  ;;  %p3629_p6 = scmp.lt.s32.totalorder %s3047_s28, %s3047_s28 }
  0x16   :  { %3260 = vmatpush3.msra.mxu0 %v57_v6  ;;  %v185_v42 = vld [vmem:[#allocation2 + $0xc0] sm:$0xff]  ;;  %3289 = vmatpush3.msra.mxu1 %v186_v41  ;;  %v3061_v62 = vld [vmem:[#allocation2 + $0xd0] ss:$0 sm:$0xff]  ;;  %p3625_p5 = scmp.ne.s32.totalorder %s3047_s28, %s3624_s29  ;;  %p3630_p7 = scmp.lt.s32.totalorder %s3624_s29, %s3624_s29 }
  0x17   :  { %3261 = vmatprep.subr.mxu0 %v56_v7  ;;  %3290 = vmatprep.subr.mxu1 %v185_v42  ;;  %v3059_v52 = vld [vmem:[#allocation2 + $0xa0] ss:$0 sm:$0xff] }
  0x18   :  { %3262 = vmatpush3.msra.mxu0 %v56_v7  ;;  %3291 = vmatpush3.msra.mxu1 %v185_v42  ;;  %v179_v5 = vld [vmem:[%s3969_s1] sm:$0x3]  ;;  %v3723_v7 = vshrl.u32 %v31_v19, 7  ;;  %s3657_s1 = smov 112   ;;  %p3631_p8 = por %p3630_p7, %p3629_p6 }
  0x19   :  { %3263 = vmatprep.subr.mxu0 %v55_v8  ;;  %3292 = vmatprep.subr.mxu1 %v184_v43  ;;  %v180_v6 = vcvt.s32.f32 %v179_v5 }
  0x1a   :  { %3264 = vmatpush3.msra.mxu0 %v55_v8  ;;  %3293 = vmatpush3.msra.mxu1 %v184_v43  ;;  %v760_v43 = vsub.s32 1, %v3723_v7  ;;  %p3632_p9 = pnand %p3631_p8, %p3625_p5 }
  0x1b   :  { %3265 = vmatprep.subr.mxu0 %v54_v9  ;;  %3294 = vmatprep.subr.mxu1 %v183_v44  ;;  %v181_v8 = vsub.f32 1.0, %v180_v6 }
  0x1c   :  { %3266 = vmatpush3.msra.mxu0 %v54_v9  ;;  %3295 = vmatpush3.msra.mxu1 %v183_v44  ;;  %v279_v9 = vsub.s32 0, %v3723_v7 }
  0x1d   :  { %3267 = vmatprep.subr.mxu0 %v53_v10  ;;  %3299 = vmatprep.subr.mxu1 %v3653_v61 }
  0x1e   :  { %3268 = vmatpush3.msra.mxu0 %v53_v10  ;;  %v3726_v10 = vmul.f32 -1e+09, %v181_v8 }
  0x1f   :  { %3269 = vmatprep.subr.mxu0 %v52_v11 }
  0x20   :  { %3270 = vmatpush3.msra.mxu0 %v52_v11  ;;  %v3729_v11 = vrot.slane %v3726_v10, %v279_v9  ;;  %v3765_v44 = vrot.slane %v3726_v10, %v760_v43 }
  0x21   :  { %3271 = vmatprep.subr.mxu0 %v51_v12 }
  0x22   :  { %3272 = vmatpush3.msra.mxu0 %v51_v12 }
  0x23   :  { %3273 = vmatprep.subr.mxu0 %v50_v13 }
  0x24   :  { %3274 = vmatpush3.msra.mxu0 %v50_v13 }
  0x25   :  { %3275 = vmatprep.subr.mxu0 %v49_v14 }
  0x26   :  { %3276 = vmatpush3.msra.mxu0 %v49_v14 }
  0x27   :  { %3277 = vmatprep.subr.mxu0 %v48_v15 }
  0x28   :  { %3278 = vmatpush3.msra.mxu0 %v48_v15 }
  0x29   :  { %3279 = vmatprep.subr.mxu0 %v47_v16 }
  0x2a   :  { %3280 = vmatpush3.msra.mxu0 %v47_v16 }
  0x2b   :  { %3281 = vmatprep.subr.mxu0 %v46_v17 }
  0x2c   :  { %3282 = vmatpush3.msra.mxu0 %v46_v17 }
  0x2d   :  { %3283 = vmatprep.subr.mxu0 %v45_v18 }
  0x2e   :  { %3284 = vmatpush3.msra.mxu0 %v45_v18 }
  0x2f   :  { %3343 = vmatprep.subr.mxu0 %v3653_v61 }
  0x8b   :  { %v35_v21 = vpop.permute.xlu0 %34 }
  0x8c   :  { %vm39_vm0 = vcmp.eq.s32.totalorder %v32_v20, %v35_v21 }
  0x8d   :  { %3285 = vmatprep.mubr.msk.f32.mxu0 %vm39_vm0, %v3652_v22 }
  0x8f   :  { %v38_v23 = vpop.permute.xlu0 %37 }
  0x90   :  { %vm40_vm1 = vcmp.eq.s32.totalorder %v32_v20, %v38_v23 }
  0x91   :  { %3286 = vmatmul.mubr.msk.f32.vlgmr.msra.gmra.mxu0 %vm40_vm1, %v3652_v22 }
  0x92   :  { %3345 = vmatprep.mubr.msk.f32.mxu0 %vm3654_vm3, %v3653_v61 }
 0x151   :  { %v3287_v24 = vpop.f32.mrf.mxu0 }
 0x152   :  { %v134_v28 = vadd.f32 %v3287_v24, %v61_v25 }
 0x153   :  { %v128_v26 = vpop.f32.mrf.mxu0 }
 0x154   :  { %v129_v27 = vadd.f32 %v128_v26, %v61_v25  ;;  %v143_v30 = vsel %vm139_vm2, %v134_v28, 0.0 }
 0x156   :  { %v140_v29 = vsel %vm139_vm2, %v129_v27, 0.0 }
 0x157   :  { %141 = vadd.xlane.f32.xlu1 %v140_v29 }
 0x15b   :  { %144 = vadd.xlane.f32.xlu1 %v143_v30 }
 0x1e0   :  { %v142_v31 = vpop.xlane.xlu1 %141 }
 0x1e1   :  { %v147_v32 = vmul.f32 0.03125, %v142_v31 }
 0x1e3   :  { %v149_v33 = vsub.f32 %v129_v27, %v147_v32 }
 0x1e4   :  { %v145_v34 = vpop.xlane.xlu1 %144 }
 0x1e5   :  { %v148_v35 = vmul.f32 0.03125, %v145_v34  ;;  %v151_v36 = vmul.f32 %v149_v33, %v149_v33 }
 0x1e7   :  { %v150_v37 = vsub.f32 %v134_v28, %v148_v35  ;;  %v153_v38 = vsel %vm139_vm2, %v151_v36, 0.0 }
 0x1e8   :  { %154 = vadd.xlane.f32.xlu0 %v153_v38 }
 0x1e9   :  { %v152_v39 = vmul.f32 %v150_v37, %v150_v37 }
 0x1eb   :  { %v156_v40 = vsel %vm139_vm2, %v152_v39, 0.0 }
 0x1ec   :  { %157 = vadd.xlane.f32.xlu1 %v156_v40 }
 0x271   :  { %v155_v45 = vpop.xlane.xlu0 %154 }
 0x272   :  { %v159_v46 = vmul.f32 0.03125, %v155_v45 }
 0x274   :  { %v161_v47 = vadd.f32 1e-12, %v159_v46 }
 0x275   :  { %v158_v48 = vpop.xlane.xlu1 %157 }
 0x276   :  { %3542 = vrsqrt.f32 %v161_v47  ;;  %v160_v49 = vmul.f32 0.03125, %v158_v48 }
 0x278   :  { %v162_v50 = vadd.f32 1e-12, %v160_v49  ;;  %v276_v49 = vld [vmem:[#allocation2 + $0xf0] sm:$0xff] }
 0x27a   :  { %3544 = vrsqrt.f32 %v162_v50  ;;  %v275_v50 = vld [vmem:[#allocation2 + $0xe8] sm:$0xff] }
 0x283   :  { %v3543_v51 = vpop.eup %3542 }
 0x284   :  { %v165_v53 = vmul.f32 %v3543_v51, %v149_v33  ;;  %v3774_v51 = vld [vmem:[#allocation2 + $0xe0] sm:$0xff] }
 0x286   :  { %v171_v55 = vmul.f32 %v3059_v52, %v165_v53  ;;  %v3777_v53 = vld [vmem:[#allocation2 + $0xd8] sm:$0xff] }
 0x287   :  { %v3545_v56 = vpop.eup %3544 }
 0x288   :  { %v166_v57 = vmul.f32 %v3545_v56, %v150_v37  ;;  %v3695_v58 = vadd.f32 %v3060_v54, %v171_v55 }
 0x28a   :  { %v172_v59 = vmul.f32 %v3059_v52, %v166_v57  ;;  %3296 = vmatprep.mubr.msk.f32.mxu1 %vm139_vm2, %v3695_v58 }
 0x28c   :  { %v3699_v60 = vadd.f32 %v3060_v54, %v172_v59 }
 0x28e   :  { %3297 = vmatmul.mubr.msk.f32.vlgmr.msra.gmra.mxu1 %vm139_vm2, %v3699_v60 }
 0x28f   :  { %3301 = vmatprep.mubr.msk.f32.mxu1 %vm3654_vm3, %v3653_v61 }
 0x34e   :  { %v3298_v63 = vpop.f32.mrf.mxu1 }
 0x34f   :  { %v3709_v0 = vadd.f32 %v3298_v63, %v3061_v62 }
 0x350   :  { %v264_v1 = vpop.f32.mrf.mxu1 }
 0x351   :  { %v265_v2 = vadd.f32 %v3061_v62, %v264_v1 }
 0x353   :  { %371 = vrot.lane.b32.xlu0 %v265_v2, %s3655_s0  ;;  %282 = vrot.lane.b32.xlu1 %v265_v2, %s3656_s2 }
 0x3c5   :  { %v283_v3 = vpop.permute.xlu1 %282  ;;  %v372_v4 = vpop.permute.xlu0 %371 }
 0x3c6   :  { %3300 = vmatpush3.xpose.msk.msra.mxu1 %vm284_vm4, %v283_v3 }
 0x3c7   :  { %3304 = vmatprep.subr.mxu1 %v3653_v61 }
 0x3c9   :  { %3302 = vmatmul.mubr.msk.f32.vlgmr.msra.gmra.mxu1 %vm284_vm4, %v265_v2 }
 0x3ca   :  { %3305 = vmatpush3.msra.mxu1 %v372_v4  ;;  %3306 = vmatprep.mubr.msk.f32.mxu1 %vm3654_vm3, %v3653_v61 }
 0x3cb   :  { %3309 = vmatprep.subr.mxu1 %v3653_v61 }
 0x489   :  { %v355_v12 = vpop.f32.mrf.mxu1 }
 0x48a   :  { %v356_v13 = vadd.f32 %v355_v12, %v3729_v11 }
 0x48b   :  { %v3303_v14 = vpop.f32.mrf.mxu1 }
 0x48c   :  { %v360_v15 = vsel %vm359_vm5, %v356_v13, -inf }
 0x48d   :  { %361 = vmax.xlane.f32.xlu1 %v360_v15 }
 0x49e   :  { %447 = vrot.lane.b32.xlu1 %v265_v2, %s3657_s1 }
 0x516   :  { %v362_v16 = vpop.xlane.xlu1 %361 }
 0x517   :  { %v363_v17 = vsub.f32 %v356_v13, %v362_v16 }
 0x519   :  { %v364_v18 = vmul.f32 1.442695, %v363_v17 }
 0x51a   :  { %v448_v25 = vpop.permute.xlu1 %447 }
 0x51b   :  { %3546 = vpow2.f32 %v364_v18 }
 0x528   :  { %v3547_v19 = vpop.eup %3546 }
 0x529   :  { %v366_v20 = vsel %vm359_vm5, %v3547_v19, 0.0 }
 0x52a   :  { %367 = vadd.xlane.f32.xlu0 %v366_v20 }
 0x540   :  { %449 = vrot.lane.b32.xlu0 %v265_v2, %s3658_s25 }
 0x5b3   :  { %v368_v21 = vpop.xlane.xlu0 %367 }
 0x5b4   :  { %3548 = vrcp.f32 %v368_v21 }
 0x5b7   :  { %v450_v24 = vpop.permute.xlu0 %449 }
 0x5c1   :  { %v3549_v22 = vpop.eup %3548 }
 0x5c2   :  { %v370_v23 = vmul.f32 %v3549_v22, %v3547_v19 }
 0x5c4   :  { %3307 = vmatmul.mubr.msk.f32.vlgmr.msra.gmra.mxu1 %vm359_vm5, %v370_v23 }
 0x5c5   :  { %3310 = vmatpush3.xpose.msk.msra.mxu1 %vm284_vm4, %v450_v24  ;;  %3311 = vmatprep.mubr.msk.f32.mxu1 %vm3654_vm3, %v3653_v61 }
 0x5c6   :  { %3314 = vmatprep.subr.mxu1 %v3653_v61 }
 0x5c8   :  { %3312 = vmatmul.mubr.msk.f32.vlgmr.msra.gmra.mxu1 %vm284_vm4, %v448_v25 }
 0x5c9   :  { %3316 = vmatprep.mubr.msk.f32.mxu1 %vm3654_vm3, %v3653_v61 }
 0x684   :  { %v443_v26 = vpop.f32.mrf.mxu1 }
 0x686   :  { %v3308_v27 = vpop.f32.mrf.mxu1 }
 0x688   :  { %v521_v28 = vpop.f32.mrf.mxu1 }
 0x689   :  { %v522_v29 = vadd.f32 %v521_v28, %v3729_v11 }
 0x68a   :  { %v3313_v30 = vpop.f32.mrf.mxu1 }
 0x68b   :  { %v525_v31 = vsel %vm359_vm5, %v522_v29, -inf }
 0x68c   :  { %526 = vmax.xlane.f32.xlu0 %v525_v31 }
 0x6a2   :  { %536 = vrot.lane.b32.xlu0 %v265_v2, %s3659_s26  ;;  %v3080_v2 = vld [vmem:[#allocation2 + $0xf8] ss:$0 sm:$0xff] }
 0x6a6   :  { %928 = vrot.lane.b32.xlu0 %v3709_v0, %s3658_s25 }
 0x6aa   :  { %926 = vrot.lane.b32.xlu0 %v3709_v0, %s3657_s1 }
 0x715   :  { %v527_v32 = vpop.xlane.xlu0 %526 }
 0x716   :  { %v528_v33 = vsub.f32 %v522_v29, %v527_v32 }
 0x718   :  { %v529_v34 = vmul.f32 1.442695, %v528_v33 }
 0x719   :  { %v537_v35 = vpop.permute.xlu0 %536 }
 0x71a   :  { %3550 = vpow2.f32 %v529_v34  ;;  %3315 = vmatpush3.msra.mxu1 %v537_v35 }
 0x71b   :  { %3319 = vmatprep.subr.mxu1 %v3653_v61 }
 0x71d   :  { %v929_v36 = vpop.permute.xlu0 %928 }
 0x71e   :  { %3344 = vmatpush3.xpose.msk.msra.mxu0 %vm284_vm4, %v929_v36 }
 0x71f   :  { %3353 = vmatprep.subr.mxu0 %v3653_v61 }
 0x721   :  { %v927_v37 = vpop.permute.xlu0 %926 }
 0x722   :  { %3346 = vmatmul.mubr.msk.f32.vlgmr.msra.gmra.mxu0 %vm284_vm4, %v927_v37 }
 0x723   :  { %3357 = vmatprep.mubr.msk.f32.mxu0 %vm3654_vm3, %v3653_v61  ;;  %3354 = vmatpush3.msra.mxu0 %v276_v49 }
 0x724   :  { %3355 = vmatprep.subr.mxu0 %v3653_v61 }
 0x725   :  { %3356 = vmatpush3.msra.mxu0 %v275_v50 }
 0x727   :  { %v3551_v38 = vpop.eup %3550 }
 0x728   :  { %v531_v39 = vsel %vm359_vm5, %v3551_v38, 0.0 }
 0x729   :  { %532 = vadd.xlane.f32.xlu1 %v531_v39 }
 0x73a   :  { %763 = vrot.lane.b32.xlu1 %v3709_v0, %s3656_s2 }
 0x7b2   :  { %v533_v40 = vpop.xlane.xlu1 %532 }
 0x7b3   :  { %3552 = vrcp.f32 %v533_v40 }
 0x7b6   :  { %v764_v55 = vpop.permute.xlu1 %763 }
 0x7c0   :  { %v3553_v41 = vpop.eup %3552 }
 0x7c1   :  { %v535_v42 = vmul.f32 %v3553_v41, %v3551_v38 }
 0x7c3   :  { %3317 = vmatmul.mubr.msk.f32.vlgmr.msra.gmra.mxu1 %vm359_vm5, %v535_v42 }
 0x7c4   :  { %3323 = vmatprep.mubr.msk.f32.mxu1 %vm3654_vm3, %v3653_v61  ;;  %3320 = vmatpush3.msra.mxu1 %v276_v49 }
 0x7c5   :  { %3321 = vmatprep.subr.mxu1 %v3653_v61 }
 0x7c6   :  { %3322 = vmatpush3.msra.mxu1 %v275_v50 }
 0x7c7   :  { %3326 = vmatprep.subr.mxu1 %v3653_v61 }
 0x7e2   :  { %v1000_v45 = vpop.f32.mrf.mxu0 }
 0x7e3   :  { %v1001_v46 = vadd.f32 %v1000_v45, %v3765_v44 }
 0x7e4   :  { %v3347_v47 = vpop.f32.mrf.mxu0 }
 0x7e5   :  { %v1004_v48 = vsel %vm359_vm5, %v1001_v46, -inf }
 0x7e6   :  { %1005 = vmax.xlane.f32.xlu1 %v1004_v48 }
 0x7f7   :  { %1015 = vrot.lane.b32.xlu1 %v3709_v0, %s3659_s26 }
 0x86f   :  { %v1006_v56 = vpop.xlane.xlu1 %1005 }
 0x870   :  { %v1007_v57 = vsub.f32 %v1001_v46, %v1006_v56 }
 0x872   :  { %v1008_v59 = vmul.f32 1.442695, %v1007_v57  ;;  %v1289_v57 = vld [vmem:[#allocation2 + $0x128] sm:$0xff] }
 0x873   :  { %v1016_v25 = vpop.permute.xlu1 %1015  ;;  %3367 = vmatprep.subr.mxu0 %v1289_v57 }
 0x874   :  { %3554 = vpow2.f32 %v1008_v59  ;;  %v1288_v59 = vld [vmem:[#allocation2 + $0x120] sm:$0xff] }
 0x881   :  { %v3555_v13 = vpop.eup %3554 }
 0x882   :  { %v1010_v14 = vsel %vm359_vm5, %v3555_v13, 0.0 }
 0x883   :  { %v608_v52 = vpop.f32.mrf.mxu1 }
 0x884   :  { %3324 = vmatmul.mubr.msk.f32.vlgmr.msra.gmra.mxu1 %vm284_vm4, %v608_v52 }
 0x885   :  { %3327 = vmatpush3.msra.mxu1 %v3774_v51  ;;  %v3318_v54 = vpop.f32.mrf.mxu1  ;;  %3330 = vmatprep.mubr.msk.f32.mxu1 %vm3654_vm3, %v3653_v61 }
 0x886   :  { %3328 = vmatprep.subr.mxu1 %v3653_v61  ;;  %v3082_v54 = vld [vmem:[#allocation2 + $0x108] ss:$0 sm:$0xff] }
 0x887   :  { %3329 = vmatpush3.msra.mxu1 %v3777_v53 }
 0x888   :  { %3333 = vmatprep.subr.mxu1 %v3653_v61  ;;  %3331 = vmatmul.mubr.msk.f32.vlgmr.msra.gmra.mxu1 %vm284_vm4, %v443_v26 }
 0x889   :  { %3334 = vmatpush3.xpose.msk.msra.mxu1 %vm284_vm4, %v764_v55  ;;  %3335 = vmatprep.mubr.msk.f32.mxu1 %vm3654_vm3, %v3653_v61 }
 0x88a   :  { %3338 = vmatprep.subr.mxu1 %v3653_v61 }
 0x88c   :  { %3336 = vmatmul.mubr.msk.f32.vlgmr.msra.gmra.mxu1 %vm284_vm4, %v3709_v0 }
 0x88d   :  { %3340 = vmatprep.mubr.msk.f32.mxu1 %vm3654_vm3, %v3653_v61 }
 0x944   :  { %v681_v62 = vpop.f32.mrf.mxu1 }
 0x946   :  { %v3325_v63 = vpop.f32.mrf.mxu1 }
 0x947   :  { %v1286_v63 = vld [vmem:[#allocation2 + $0x110] sm:$0xff] }
 0x948   :  { %v754_v1 = vpop.f32.mrf.mxu1 }
 0x949   :  { %v755_v3 = vadd.f32 %v754_v1, %v681_v62  ;;  %v1287_v62 = vld [vmem:[#allocation2 + $0x118] sm:$0xff] }
 0x94a   :  { %v3332_v4 = vpop.f32.mrf.mxu1 }
 0x94b   :  { %v1242_v5 = vadd.f32 %v3080_v2, %v755_v3 }
 0x94c   :  { %v835_v6 = vpop.f32.mrf.mxu1 }
 0x94d   :  { %v836_v7 = vadd.f32 %v835_v6, %v3765_v44  ;;  %v1244_v8 = vadd.f32 %v1242_v5, %v3695_v58 }
 0x94e   :  { %v3337_v9 = vpop.f32.mrf.mxu1 }
 0x94f   :  { %v1248_v10 = vsel %vm139_vm2, %v1244_v8, 0.0  ;;  %v839_v12 = vsel %vm359_vm5, %v836_v7, -inf  ;;  %v1400_v9 = vld [vmem:[#allocation2 + $0x168] sm:$0xff] }
 0x950   :  { %1249 = vadd.xlane.f32.xlu1 %v1248_v10  ;;  %840 = vmax.xlane.f32.xlu0 %v839_v12  ;;  %v1399_v10 = vld [vmem:[#allocation2 + $0x160] sm:$0xff]  ;;  %v1398_v12 = vld [vmem:[#allocation2 + $0x158] sm:$0xff] }
 0x954   :  { %1011 = vadd.xlane.f32.xlu0 %v1010_v14  ;;  %v1396_v14 = vld [vmem:[#allocation2 + $0x148] sm:$0xff] }
 0x9d9   :  { %v841_v15 = vpop.xlane.xlu0 %840  ;;  %v1250_v30 = vpop.xlane.xlu1 %1249 }
 0x9da   :  { %v842_v16 = vsub.f32 %v836_v7, %v841_v15  ;;  %v1254_v33 = vmul.f32 0.03125, %v1250_v30  ;;  %v1395_v15 = vld [vmem:[#allocation2 + $0x140] sm:$0xff] }
 0x9dc   :  { %v843_v17 = vmul.f32 1.442695, %v842_v16  ;;  %v1256_v37 = vsub.f32 %v1244_v8, %v1254_v33  ;;  %v1401_v8 = vld [vmem:[#allocation2 + $0x170] sm:$0xff]  ;;  %v1394_v16 = vld [vmem:[#allocation2 + $0x138] sm:$0xff] }
 0x9dd   :  { %v1012_v58 = vpop.xlane.xlu0 %1011 }
 0x9de   :  { %3556 = vpow2.f32 %v843_v17  ;;  %v1258_v41 = vmul.f32 %v1256_v37, %v1256_v37  ;;  %v3083_v17 = vld [vmem:[#allocation2 + $0x130] ss:$0 sm:$0xff] }
 0x9e0   :  { %v1260_v42 = vsel %vm139_vm2, %v1258_v41, 0.0 }
 0x9eb   :  { %v3557_v18 = vpop.eup %3556 }
 0x9ec   :  { %v845_v19 = vsel %vm359_vm5, %v3557_v18, 0.0 }
 0x9ed   :  { %846 = vadd.xlane.f32.xlu0 %v845_v19 }
 0xa03   :  { %850 = vrot.lane.b32.xlu0 %v3709_v0, %s3655_s0 }
 0xa76   :  { %v847_v20 = vpop.xlane.xlu0 %846 }
 0xa77   :  { %3558 = vrcp.f32 %v847_v20 }
 0xa78   :  { %3560 = vrcp.f32 %v1012_v58 }
 0xa7a   :  { %v851_v21 = vpop.permute.xlu0 %850 }
 0xa7b   :  { %3339 = vmatpush3.msra.mxu1 %v851_v21 }
 0xa7c   :  { %3348 = vmatprep.subr.mxu1 %v3653_v61 }
 0xa84   :  { %v3559_v22 = vpop.eup %3558 }
 0xa85   :  { %v849_v23 = vmul.f32 %v3559_v22, %v3557_v18  ;;  %v3561_v24 = vpop.eup %3560 }
 0xa86   :  { %v1014_v26 = vmul.f32 %v3561_v24, %v3555_v13  ;;  %v1397_v13 = vld [vmem:[#allocation2 + $0x150] sm:$0xff] }
 0xa87   :  { %3341 = vmatmul.mubr.msk.f32.vlgmr.msra.gmra.mxu1 %vm359_vm5, %v849_v23 }
 0xa88   :  { %3349 = vmatpush3.msra.mxu1 %v1016_v25  ;;  %3350 = vmatprep.mubr.msk.f32.mxu1 %vm3654_vm3, %v3653_v61 }
 0xa89   :  { %3360 = vmatprep.subr.mxu1 %v3653_v61 }
 0xa8b   :  { %3351 = vmatmul.mubr.msk.f32.vlgmr.msra.gmra.mxu1 %vm359_vm5, %v1014_v26 }
 0xa8c   :  { %3361 = vmatpush3.msra.mxu1 %v3774_v51  ;;  %3364 = vmatprep.mubr.msk.f32.mxu1 %vm3654_vm3, %v3653_v61 }
 0xa8d   :  { %3362 = vmatprep.subr.mxu1 %v3653_v61 }
 0xa8e   :  { %3363 = vmatpush3.msra.mxu1 %v3777_v53 }
 0xa8f   :  { %3378 = vmatprep.subr.mxu1 %v1401_v8 }
 0xb47   :  { %v922_v0 = vpop.f32.mrf.mxu1 }
 0xb48   :  { %3365 = vmatmul.mubr.msk.f32.vlgmr.msra.gmra.mxu1 %vm284_vm4, %v922_v0 }
 0xb49   :  { %v3342_v27 = vpop.f32.mrf.mxu1  ;;  %3379 = vmatpush3.msra.mxu1 %v1401_v8  ;;  %v3089_v8 = vld [vmem:[#allocation2 + $0x180] ss:$0 sm:$0xff] }
 0xb4a   :  { %3380 = vmatprep.subr.mxu1 %v1400_v9 }
 0xb4b   :  { %v1087_v28 = vpop.f32.mrf.mxu1  ;;  %3381 = vmatpush3.msra.mxu1 %v1400_v9 }
 0xb4c   :  { %3358 = vmatmul.mubr.msk.f32.vlgmr.msra.gmra.mxu0 %vm284_vm4, %v1087_v28  ;;  %3382 = vmatprep.subr.mxu1 %v1399_v10 }
 0xb4d   :  { %v3352_v29 = vpop.f32.mrf.mxu1  ;;  %3368 = vmatpush3.msra.mxu0 %v1289_v57  ;;  %3383 = vmatpush3.msra.mxu1 %v1399_v10 }
 0xb4e   :  { %3369 = vmatprep.subr.mxu0 %v1288_v59  ;;  %3384 = vmatprep.subr.mxu1 %v1398_v12 }
 0xb4f   :  { %3370 = vmatpush3.msra.mxu0 %v1288_v59  ;;  %3385 = vmatpush3.msra.mxu1 %v1398_v12  ;;  %v1534_v59 = vld [vmem:[#allocation2 + $0x1a8] sm:$0xff] }
 0xb50   :  { %3371 = vmatprep.subr.mxu0 %v1287_v62  ;;  %3386 = vmatprep.subr.mxu1 %v1397_v13 }
 0xb51   :  { %3372 = vmatpush3.msra.mxu0 %v1287_v62  ;;  %3387 = vmatpush3.msra.mxu1 %v1397_v13  ;;  %v1532_v62 = vld [vmem:[#allocation2 + $0x198] sm:$0xff] }
 0xb52   :  { %3373 = vmatprep.subr.mxu0 %v1286_v63  ;;  %3388 = vmatprep.subr.mxu1 %v1396_v14 }
 0xb53   :  { %3374 = vmatpush3.msra.mxu0 %v1286_v63  ;;  %3389 = vmatpush3.msra.mxu1 %v1396_v14  ;;  %v1531_v63 = vld [vmem:[#allocation2 + $0x190] sm:$0xff]  ;;  %v3090_v14 = vld [vmem:[#allocation2 + $0x188] ss:$0 sm:$0xff] }
 0xb54   :  { %3390 = vmatprep.subr.mxu1 %v1395_v15  ;;  %3397 = vmatprep.subr.mxu0 %v1534_v59 }
 0xb55   :  { %3391 = vmatpush3.msra.mxu1 %v1395_v15 }
 0xb56   :  { %3392 = vmatprep.subr.mxu1 %v1394_v16 }
 0xb57   :  { %3393 = vmatpush3.msra.mxu1 %v1394_v16 }
 0xb58   :  { %3413 = vmatprep.subr.mxu1 %v3653_v61 }
 0xc08   :  { %v1233_v31 = vpop.f32.mrf.mxu1 }
 0xc0a   :  { %v3366_v32 = vpop.f32.mrf.mxu1 }
 0xc0c   :  { %v1160_v34 = vpop.f32.mrf.mxu0 }
 0xc0d   :  { %v1234_v35 = vadd.f32 %v1233_v31, %v1160_v34 }
 0xc0e   :  { %v3359_v36 = vpop.f32.mrf.mxu0 }
 0xc0f   :  { %v1243_v38 = vadd.f32 %v3080_v2, %v1234_v35 }
 0xc11   :  { %v1245_v39 = vadd.f32 %v1243_v38, %v3699_v60  ;;  %v3081_v60 = vld [vmem:[#allocation2 + $0x100] ss:$0 sm:$0xff]  ;;  %v3086_v38 = vld [vmem:[#allocation2 + $0x178] ss:$0 sm:$0xff] }
 0xc13   :  { %v1251_v40 = vsel %vm139_vm2, %v1245_v39, 0.0 }
 0xc14   :  { %1252 = vadd.xlane.f32.xlu0 %v1251_v40 }
 0xc18   :  { %1261 = vadd.xlane.f32.xlu0 %v1260_v42 }
 0xc9d   :  { %v1253_v43 = vpop.xlane.xlu0 %1252 }
 0xc9e   :  { %v1255_v45 = vmul.f32 0.03125, %v1253_v43 }
 0xca0   :  { %v1257_v46 = vsub.f32 %v1245_v39, %v1255_v45 }
 0xca1   :  { %v1262_v47 = vpop.xlane.xlu0 %1261 }
 0xca2   :  { %v1266_v48 = vmul.f32 0.03125, %v1262_v47  ;;  %v1259_v49 = vmul.f32 %v1257_v46, %v1257_v46 }
 0xca4   :  { %v1268_v50 = vadd.f32 1e-12, %v1266_v48  ;;  %v1263_v51 = vsel %vm139_vm2, %v1259_v49, 0.0 }
 0xca5   :  { %1264 = vadd.xlane.f32.xlu1 %v1263_v51 }
 0xca6   :  { %3562 = vrsqrt.f32 %v1268_v50 }
 0xcb3   :  { %v3563_v52 = vpop.eup %3562 }
 0xcb4   :  { %v1272_v53 = vmul.f32 %v3563_v52, %v1256_v37 }
 0xcb6   :  { %v1278_v55 = vmul.f32 %v3081_v60, %v1272_v53 }
 0xcb8   :  { %v3819_v56 = vadd.f32 %v3082_v54, %v1278_v55 }
 0xcba   :  { %3375 = vmatprep.mubr.msk.f32.mxu0 %vm139_vm2, %v3819_v56 }
 0xd2e   :  { %v1265_v1 = vpop.xlane.xlu1 %1264 }
 0xd2f   :  { %v1267_v2 = vmul.f32 0.03125, %v1265_v1 }
 0xd31   :  { %v1269_v3 = vadd.f32 1e-12, %v1267_v2 }
 0xd33   :  { %3564 = vrsqrt.f32 %v1269_v3 }
 0xd40   :  { %v3565_v4 = vpop.eup %3564 }
 0xd41   :  { %v1273_v5 = vmul.f32 %v3565_v4, %v1257_v46 }
 0xd43   :  { %v1279_v6 = vmul.f32 %v3081_v60, %v1273_v5 }
 0xd45   :  { %v1285_v7 = vadd.f32 %v3082_v54, %v1279_v6 }
 0xd47   :  { %3376 = vmatmul.mubr.msk.f32.vlgmr.msra.gmra.mxu0 %vm139_vm2, %v1285_v7 }
 0xd48   :  { %3398 = vmatpush3.msra.mxu0 %v1534_v59 }
 0xe07   :  { %v3377_v18 = vpop.f32.mrf.mxu0 }
 0xe08   :  { %v1373_v19 = vadd.f32 %v3377_v18, %v3083_v17  ;;  %v3091_v18 = vld [vmem:[#allocation2 + $0x1b0] ss:$0 sm:$0xff] }
 0xe09   :  { %v1367_v58 = vpop.f32.mrf.mxu0 }
 0xe0a   :  { %v1379_v20 = vmul.f32 0.044715, %v1373_v19  ;;  %v1368_v21 = vadd.f32 %v3083_v17, %v1367_v58  ;;  %v1377_v35 = vmul.f32 0.5, %v1373_v19 }
 0xe0c   :  { %v1381_v22 = vmul.f32 %v1379_v20, %v1373_v19  ;;  %v1378_v23 = vmul.f32 0.044715, %v1368_v21  ;;  %v1376_v33 = vmul.f32 0.5, %v1368_v21 }
 0xe0e   :  { %v1383_v24 = vmul.f32 %v1381_v22, %v1373_v19  ;;  %v1380_v25 = vmul.f32 %v1378_v23, %v1368_v21 }
 0xe10   :  { %v1385_v26 = vadd.f32 %v1383_v24, %v1373_v19  ;;  %v1382_v0 = vmul.f32 %v1380_v25, %v1368_v21 }
 0xe12   :  { %v1387_v27 = vmul.f32 0.7978846, %v1385_v26  ;;  %v1384_v28 = vadd.f32 %v1382_v0, %v1368_v21 }
 0xe14   :  { %3566 = vtanh.f32 %v1387_v27  ;;  %v1386_v29 = vmul.f32 0.7978846, %v1384_v28 }
 0xe16   :  { %3568 = vtanh.f32 %v1386_v29 }
 0xe21   :  { %v3567_v30 = vpop.eup %3566 }
 0xe22   :  { %v1391_v32 = vadd.f32 1.0, %v3567_v30 }
 0xe23   :  { %v3569_v31 = vpop.eup %3568 }
 0xe24   :  { %v1390_v34 = vadd.f32 1.0, %v3569_v31  ;;  %v1393_v37 = vmul.f32 %v1391_v32, %v1377_v35 }
 0xe26   :  { %v1392_v36 = vmul.f32 %v1390_v34, %v1376_v33 }
 0xe28   :  { %3394 = vmatprep.mubr.msk.f32.mxu1 %vm1407_vm6, %v1392_v36 }
 0xe29   :  { %3395 = vmatmul.mubr.msk.f32.vlgmr.msra.gmra.mxu1 %vm1407_vm6, %v1393_v37 }
 0xe2a   :  { %3415 = vmatprep.mubr.msk.f32.mxu1 %vm3654_vm3, %v3653_v61 }
 0xee9   :  { %v3396_v39 = vpop.f32.mrf.mxu1 }
 0xeea   :  { %v1486_v40 = vadd.f32 %v3396_v39, %v3086_v38 }
 0xeeb   :  { %v1480_v41 = vpop.f32.mrf.mxu1 }
 0xeec   :  { %v1481_v42 = vadd.f32 %v3086_v38, %v1480_v41  ;;  %v1490_v43 = vadd.f32 %v1486_v40, %v1285_v7 }
 0xeee   :  { %v1496_v45 = vsel %vm139_vm2, %v1490_v43, 0.0  ;;  %v1489_v46 = vadd.f32 %v1481_v42, %v3819_v56  ;;  %v1533_v56 = vld [vmem:[#allocation2 + $0x1a0] sm:$0xff] }
 0xeef   :  { %1497 = vadd.xlane.f32.xlu1 %v1496_v45  ;;  %3399 = vmatprep.subr.mxu0 %v1533_v56 }
 0xef0   :  { %v1493_v47 = vsel %vm139_vm2, %v1489_v46, 0.0  ;;  %3400 = vmatpush3.msra.mxu0 %v1533_v56 }
 0xef1   :  { %1494 = vadd.xlane.f32.xlu0 %v1493_v47  ;;  %3401 = vmatprep.subr.mxu0 %v1532_v62 }
 0xef2   :  { %3402 = vmatpush3.msra.mxu0 %v1532_v62 }
 0xef3   :  { %3403 = vmatprep.subr.mxu0 %v1531_v63 }
 0xef4   :  { %3404 = vmatpush3.msra.mxu0 %v1531_v63 }
 0xef5   :  { %3408 = vmatprep.subr.mxu0 %v3653_v61 }
 0xf78   :  { %v1498_v48 = vpop.xlane.xlu1 %1497 }
 0xf79   :  { %v1500_v49 = vmul.f32 0.03125, %v1498_v48 }
 0xf7a   :  { %v1495_v50 = vpop.xlane.xlu0 %1494 }
 0xf7b   :  { %v1502_v51 = vsub.f32 %v1490_v43, %v1500_v49  ;;  %v1499_v52 = vmul.f32 0.03125, %v1495_v50  ;;  %v3879_v50 = vld [vmem:[#allocation2 + $0x1c0] sm:$0xff] }
 0xf7d   :  { %v1501_v60 = vsub.f32 %v1489_v46, %v1499_v52  ;;  %v1504_v53 = vmul.f32 %v1502_v51, %v1502_v51  ;;  %v1624_v52 = vld [vmem:[#allocation2 + $0x1d0] sm:$0xff] }
 0xf7f   :  { %v1508_v54 = vsel %vm139_vm2, %v1504_v53, 0.0  ;;  %v1503_v55 = vmul.f32 %v1501_v60, %v1501_v60 }
 0xf80   :  { %1509 = vadd.xlane.f32.xlu1 %v1508_v54 }
 0xf81   :  { %v1505_v57 = vsel %vm139_vm2, %v1503_v55, 0.0 }
 0xf82   :  { %1506 = vadd.xlane.f32.xlu0 %v1505_v57 }
0x1009   :  { %v1510_v1 = vpop.xlane.xlu1 %1509 }
0x100a   :  { %v1512_v2 = vmul.f32 0.03125, %v1510_v1 }
0x100b   :  { %v1507_v3 = vpop.xlane.xlu0 %1506 }
0x100c   :  { %v1514_v4 = vadd.f32 1e-12, %v1512_v2  ;;  %v1511_v5 = vmul.f32 0.03125, %v1507_v3 }
0x100e   :  { %3570 = vrsqrt.f32 %v1514_v4  ;;  %v1513_v6 = vadd.f32 1e-12, %v1511_v5 }
0x1010   :  { %3572 = vrsqrt.f32 %v1513_v6 }
0x101b   :  { %v3571_v7 = vpop.eup %3570 }
0x101c   :  { %v1518_v9 = vmul.f32 %v3571_v7, %v1502_v51  ;;  %v3886_v51 = vld [vmem:[#allocation2 + $0x1b8] sm:$0xff] }
0x101d   :  { %v3573_v10 = vpop.eup %3572 }
0x101e   :  { %v1517_v12 = vmul.f32 %v3573_v10, %v1501_v60  ;;  %v1524_v13 = vmul.f32 %v3089_v8, %v1518_v9  ;;  %v1623_v60 = vld [vmem:[#allocation2 + $0x1c8] sm:$0xff] }
0x1020   :  { %v1523_v15 = vmul.f32 %v3089_v8, %v1517_v12  ;;  %v3837_v17 = vadd.f32 %v3090_v14, %v1524_v13 }
0x1022   :  { %v3835_v16 = vadd.f32 %v3090_v14, %v1523_v15 }
0x1024   :  { %3405 = vmatprep.mubr.msk.f32.mxu0 %vm139_vm2, %v3835_v16 }
0x1025   :  { %3406 = vmatmul.mubr.msk.f32.vlgmr.msra.gmra.mxu0 %vm139_vm2, %v3837_v17 }
0x1026   :  { %3410 = vmatprep.mubr.msk.f32.mxu0 %vm3654_vm3, %v3653_v61 }
0x10e5   :  { %v3407_v19 = vpop.f32.mrf.mxu0 }
0x10e6   :  { %v3845_v58 = vadd.f32 %v3407_v19, %v3091_v18 }
0x10e7   :  { %v1612_v20 = vpop.f32.mrf.mxu0 }
0x10e8   :  { %v1613_v21 = vadd.f32 %v3091_v18, %v1612_v20 }
0x10ea   :  { %1791 = vrot.lane.b32.xlu1 %v1613_v21, %s3658_s25  ;;  %1626 = vrot.lane.b32.xlu0 %v1613_v21, %s3656_s2 }
0x10ee   :  { %1789 = vrot.lane.b32.xlu1 %v1613_v21, %s3657_s1 }
0x115c   :  { %v1627_v22 = vpop.permute.xlu0 %1626  ;;  %v1792_v23 = vpop.permute.xlu1 %1791 }
0x115d   :  { %3409 = vmatpush3.xpose.msk.msra.mxu0 %vm284_vm4, %v1627_v22 }
0x115e   :  { %3418 = vmatprep.subr.mxu0 %v3653_v61 }
0x1160   :  { %3411 = vmatmul.mubr.msk.f32.vlgmr.msra.gmra.mxu0 %vm284_vm4, %v1613_v21  ;;  %v1790_v24 = vpop.permute.xlu1 %1789 }
0x1161   :  { %3419 = vmatpush3.xpose.msk.msra.mxu0 %vm284_vm4, %v1792_v23  ;;  %3420 = vmatprep.mubr.msk.f32.mxu0 %vm3654_vm3, %v3653_v61 }
0x1162   :  { %3428 = vmatprep.subr.mxu0 %v3653_v61 }
0x1164   :  { %3421 = vmatmul.mubr.msk.f32.vlgmr.msra.gmra.mxu0 %vm284_vm4, %v1790_v24 }
0x1165   :  { %3432 = vmatprep.mubr.msk.f32.mxu0 %vm3654_vm3, %v3653_v61  ;;  %3429 = vmatpush3.msra.mxu0 %v1624_v52 }
0x1166   :  { %3430 = vmatprep.subr.mxu0 %v3653_v61 }
0x1167   :  { %3431 = vmatpush3.msra.mxu0 %v1623_v60 }
0x1168   :  { %3442 = vmatprep.subr.mxu0 %v3653_v61 }
0x1220   :  { %v1698_v25 = vpop.f32.mrf.mxu0 }
0x1221   :  { %v1699_v26 = vadd.f32 %v1698_v25, %v3729_v11 }
0x1222   :  { %v3412_v0 = vpop.f32.mrf.mxu0 }
0x1223   :  { %v1702_v27 = vsel %vm359_vm5, %v1699_v26, -inf }
0x1224   :  { %1703 = vmax.xlane.f32.xlu0 %v1702_v27  ;;  %v1863_v28 = vpop.f32.mrf.mxu0 }
0x1225   :  { %v1864_v29 = vadd.f32 %v1863_v28, %v3729_v11 }
0x1226   :  { %v3422_v30 = vpop.f32.mrf.mxu0 }
0x1227   :  { %v1867_v31 = vsel %vm359_vm5, %v1864_v29, -inf }
0x1228   :  { %1868 = vmax.xlane.f32.xlu1 %v1867_v31 }
0x1239   :  { %1713 = vrot.lane.b32.xlu1 %v1613_v21, %s3655_s0 }
0x123d   :  { %2101 = vrot.lane.b32.xlu1 %v3845_v58, %s3656_s2 }
0x1241   :  { %2266 = vrot.lane.b32.xlu1 %v3845_v58, %s3658_s25 }
0x12ad   :  { %v1704_v32 = vpop.xlane.xlu0 %1703 }
0x12ae   :  { %v1705_v33 = vsub.f32 %v1699_v26, %v1704_v32 }
0x12b0   :  { %v1706_v34 = vmul.f32 1.442695, %v1705_v33 }
0x12b1   :  { %v1869_v35 = vpop.xlane.xlu1 %1868 }
0x12b2   :  { %3574 = vpow2.f32 %v1706_v34  ;;  %v1870_v36 = vsub.f32 %v1864_v29, %v1869_v35 }
0x12b4   :  { %v1871_v37 = vmul.f32 1.442695, %v1870_v36 }
0x12b5   :  { %v1714_v11 = vpop.permute.xlu1 %1713 }
0x12b6   :  { %3576 = vpow2.f32 %v1871_v37  ;;  %3414 = vmatpush3.msra.mxu1 %v1714_v11 }
0x12b7   :  { %3423 = vmatprep.subr.mxu1 %v3653_v61 }
0x12b9   :  { %v2102_v55 = vpop.permute.xlu1 %2101 }
0x12bd   :  { %v2267_v56 = vpop.permute.xlu1 %2266 }
0x12bf   :  { %v3575_v38 = vpop.eup %3574 }
0x12c0   :  { %v1708_v39 = vsel %vm359_vm5, %v3575_v38, 0.0 }
0x12c1   :  { %1709 = vadd.xlane.f32.xlu0 %v1708_v39 }
0x12c3   :  { %v3577_v40 = vpop.eup %3576 }
0x12c4   :  { %v1873_v41 = vsel %vm359_vm5, %v3577_v40, 0.0 }
0x12c5   :  { %1874 = vadd.xlane.f32.xlu0 %v1873_v41 }
0x12db   :  { %1878 = vrot.lane.b32.xlu0 %v1613_v21, %s3659_s26 }
0x12df   :  { %2264 = vrot.lane.b32.xlu0 %v3845_v58, %s3657_s1 }
0x134a   :  { %v1710_v42 = vpop.xlane.xlu0 %1709 }
0x134b   :  { %3578 = vrcp.f32 %v1710_v42 }
0x134e   :  { %v1875_v43 = vpop.xlane.xlu0 %1874 }
0x134f   :  { %3580 = vrcp.f32 %v1875_v43 }
0x1352   :  { %v1879_v47 = vpop.permute.xlu0 %1878 }
0x1356   :  { %v2265_v62 = vpop.permute.xlu0 %2264 }
0x1358   :  { %v3579_v45 = vpop.eup %3578 }
0x1359   :  { %v1712_v46 = vmul.f32 %v3579_v45, %v3575_v38 }
0x135b   :  { %3416 = vmatmul.mubr.msk.f32.vlgmr.msra.gmra.mxu1 %vm359_vm5, %v1712_v46 }
0x135c   :  { %v3581_v48 = vpop.eup %3580  ;;  %3424 = vmatpush3.msra.mxu1 %v1879_v47  ;;  %3425 = vmatprep.mubr.msk.f32.mxu1 %vm3654_vm3, %v3653_v61 }
0x135d   :  { %v1877_v49 = vmul.f32 %v3581_v48, %v3577_v40  ;;  %3435 = vmatprep.subr.mxu1 %v3653_v61 }
0x135f   :  { %3426 = vmatmul.mubr.msk.f32.vlgmr.msra.gmra.mxu1 %vm359_vm5, %v1877_v49 }
0x1360   :  { %3436 = vmatpush3.msra.mxu1 %v3879_v50  ;;  %3439 = vmatprep.mubr.msk.f32.mxu1 %vm3654_vm3, %v3653_v61 }
0x1361   :  { %3437 = vmatprep.subr.mxu1 %v3653_v61 }
0x1362   :  { %3438 = vmatpush3.msra.mxu1 %v3886_v51 }
0x1363   :  { %3447 = vmatprep.subr.mxu1 %v3653_v61 }
0x141b   :  { %v1785_v53 = vpop.f32.mrf.mxu1 }
0x141c   :  { %3440 = vmatmul.mubr.msk.f32.vlgmr.msra.gmra.mxu1 %vm284_vm4, %v1785_v53 }
0x141d   :  { %v3417_v54 = vpop.f32.mrf.mxu1  ;;  %3449 = vmatprep.mubr.msk.f32.mxu1 %vm3654_vm3, %v3653_v61 }
0x141f   :  { %v1950_v57 = vpop.f32.mrf.mxu1 }
0x1420   :  { %3433 = vmatmul.mubr.msk.f32.vlgmr.msra.gmra.mxu0 %vm284_vm4, %v1950_v57 }
0x1421   :  { %3443 = vmatpush3.xpose.msk.msra.mxu0 %vm284_vm4, %v2102_v55  ;;  %v3427_v59 = vpop.f32.mrf.mxu1  ;;  %3444 = vmatprep.mubr.msk.f32.mxu0 %vm3654_vm3, %v3653_v61 }
0x1422   :  { %3452 = vmatprep.subr.mxu0 %v3653_v61 }
0x1424   :  { %3445 = vmatmul.mubr.msk.f32.vlgmr.msra.gmra.mxu0 %vm284_vm4, %v3845_v58 }
0x1425   :  { %3453 = vmatpush3.xpose.msk.msra.mxu0 %vm284_vm4, %v2267_v56  ;;  %3454 = vmatprep.mubr.msk.f32.mxu0 %vm3654_vm3, %v3653_v61 }
0x1426   :  { %3462 = vmatprep.subr.mxu0 %v3653_v61 }
0x1428   :  { %3455 = vmatmul.mubr.msk.f32.vlgmr.msra.gmra.mxu0 %vm284_vm4, %v2265_v62 }
0x1429   :  { %3463 = vmatpush3.msra.mxu0 %v1624_v52  ;;  %3466 = vmatprep.mubr.msk.f32.mxu0 %vm3654_vm3, %v3653_v61 }
0x142a   :  { %3464 = vmatprep.subr.mxu0 %v3653_v61 }
0x142b   :  { %3465 = vmatpush3.msra.mxu0 %v1623_v60 }
0x14dc   :  { %v2096_v63 = vpop.f32.mrf.mxu1 }
0x14de   :  { %v3441_v1 = vpop.f32.mrf.mxu1 }
0x14e0   :  { %v2023_v2 = vpop.f32.mrf.mxu0 }
0x14e1   :  { %v2097_v3 = vadd.f32 %v2096_v63, %v2023_v2  ;;  %v3112_v63 = vld [vmem:[#allocation2 + $0x1e8] ss:$0 sm:$0xff] }
0x14e2   :  { %v3434_v4 = vpop.f32.mrf.mxu0 }
0x14e3   :  { %v2626_v4 = vld [vmem:[#allocation2 + $0x200] sm:$0xff] }
0x14e4   :  { %v2173_v5 = vpop.f32.mrf.mxu0 }
0x14e5   :  { %v2174_v6 = vadd.f32 %v2173_v5, %v3765_v44  ;;  %v2625_v5 = vld [vmem:[#allocation2 + $0x1f8] sm:$0xff] }
0x14e6   :  { %v3446_v7 = vpop.f32.mrf.mxu0 }
0x14e7   :  { %v2177_v8 = vsel %vm359_vm5, %v2174_v6, -inf }
0x14e8   :  { %2178 = vmax.xlane.f32.xlu1 %v2177_v8  ;;  %v2338_v9 = vpop.f32.mrf.mxu0 }
0x14e9   :  { %v2339_v10 = vadd.f32 %v2338_v9, %v3765_v44  ;;  %v3110_v44 = vld [vmem:[#allocation2 + $0x1d8] ss:$0 sm:$0xff] }
0x14ea   :  { %v3456_v12 = vpop.f32.mrf.mxu0  ;;  %v2580_v26 = vadd.f32 %v3110_v44, %v2097_v3  ;;  %v2627_v3 = vld [vmem:[#allocation2 + $0x208] sm:$0xff] }
0x14eb   :  { %v2342_v13 = vsel %vm359_vm5, %v2339_v10, -inf  ;;  %3476 = vmatprep.subr.mxu0 %v2627_v3 }
0x14ec   :  { %2343 = vmax.xlane.f32.xlu0 %v2342_v13  ;;  %v2582_v0 = vadd.f32 %v2580_v26, %v3835_v16 }
0x14ee   :  { %v2586_v27 = vsel %vm139_vm2, %v2582_v0, 0.0 }
0x1571   :  { %v2179_v14 = vpop.xlane.xlu1 %2178 }
0x1572   :  { %v2180_v15 = vsub.f32 %v2174_v6, %v2179_v14  ;;  %v2624_v6 = vld [vmem:[#allocation2 + $0x1f0] sm:$0xff] }
0x1574   :  { %v2181_v18 = vmul.f32 1.442695, %v2180_v15  ;;  %v2739_v15 = vld [vmem:[#allocation2 + $0x250] sm:$0xff] }
0x1575   :  { %v2344_v19 = vpop.xlane.xlu0 %2343 }
0x1576   :  { %3582 = vpow2.f32 %v2181_v18  ;;  %v2345_v20 = vsub.f32 %v2339_v10, %v2344_v19  ;;  %v2738_v18 = vld [vmem:[#allocation2 + $0x248] sm:$0xff]  ;;  %v2737_v19 = vld [vmem:[#allocation2 + $0x240] sm:$0xff] }
0x1578   :  { %v2346_v21 = vmul.f32 1.442695, %v2345_v20  ;;  %v2736_v20 = vld [vmem:[#allocation2 + $0x238] sm:$0xff] }
0x157a   :  { %3584 = vpow2.f32 %v2346_v21  ;;  %v2735_v21 = vld [vmem:[#allocation2 + $0x230] sm:$0xff] }
0x1583   :  { %v3583_v22 = vpop.eup %3582 }
0x1584   :  { %v2183_v23 = vsel %vm359_vm5, %v3583_v22, 0.0 }
0x1585   :  { %2184 = vadd.xlane.f32.xlu0 %v2183_v23  ;;  %v2733_v23 = vld [vmem:[#allocation2 + $0x220] sm:$0xff] }
0x1587   :  { %v3585_v24 = vpop.eup %3584 }
0x1588   :  { %v2348_v25 = vsel %vm359_vm5, %v3585_v24, 0.0 }
0x1589   :  { %2349 = vadd.xlane.f32.xlu1 %v2348_v25  ;;  %v3113_v25 = vld [vmem:[#allocation2 + $0x210] ss:$0 sm:$0xff] }
0x159a   :  { %2353 = vrot.lane.b32.xlu1 %v3845_v58, %s3659_s26 }
0x159b   :  { %2188 = vrot.lane.b32.xlu0 %v3845_v58, %s3655_s0 }
0x15be   :  { %2587 = vadd.xlane.f32.xlu1 %v2586_v27 }
0x160e   :  { %v2185_v28 = vpop.xlane.xlu0 %2184 }
0x160f   :  { %3586 = vrcp.f32 %v2185_v28 }
0x1612   :  { %v2350_v29 = vpop.xlane.xlu1 %2349  ;;  %v2189_v30 = vpop.permute.xlu0 %2188 }
0x1613   :  { %3588 = vrcp.f32 %v2350_v29  ;;  %3448 = vmatpush3.msra.mxu1 %v2189_v30 }
0x1614   :  { %3457 = vmatprep.subr.mxu1 %v3653_v61 }
0x1616   :  { %v2354_v33 = vpop.permute.xlu1 %2353 }
0x161c   :  { %v3587_v31 = vpop.eup %3586 }
0x161d   :  { %v2187_v32 = vmul.f32 %v3587_v31, %v3583_v22  ;;  %v2734_v22 = vld [vmem:[#allocation2 + $0x228] sm:$0xff] }
0x161f   :  { %3450 = vmatmul.mubr.msk.f32.vlgmr.msra.gmra.mxu1 %vm359_vm5, %v2187_v32 }
0x1620   :  { %v3589_v58 = vpop.eup %3588  ;;  %3458 = vmatpush3.msra.mxu1 %v2354_v33  ;;  %3459 = vmatprep.mubr.msk.f32.mxu1 %vm3654_vm3, %v3653_v61 }
0x1621   :  { %v2352_v16 = vmul.f32 %v3589_v58, %v3585_v24  ;;  %3469 = vmatprep.subr.mxu1 %v3653_v61  ;;  %v2732_v24 = vld [vmem:[#allocation2 + $0x218] sm:$0xff] }
0x1623   :  { %3460 = vmatmul.mubr.msk.f32.vlgmr.msra.gmra.mxu1 %vm359_vm5, %v2352_v16 }
0x1624   :  { %3470 = vmatpush3.msra.mxu1 %v3879_v50  ;;  %3473 = vmatprep.mubr.msk.f32.mxu1 %vm3654_vm3, %v3653_v61 }
0x1625   :  { %3471 = vmatprep.subr.mxu1 %v3653_v61 }
0x1626   :  { %3472 = vmatpush3.msra.mxu1 %v3886_v51 }
0x1627   :  { %3487 = vmatprep.subr.mxu1 %v2739_v15 }
0x1647   :  { %v2588_v11 = vpop.xlane.xlu1 %2587 }
0x1648   :  { %v2592_v40 = vmul.f32 0.03125, %v2588_v11 }
0x164a   :  { %v2594_v45 = vsub.f32 %v2582_v0, %v2592_v40 }
0x164c   :  { %v2596_v49 = vmul.f32 %v2594_v45, %v2594_v45 }
0x164e   :  { %v2598_v50 = vsel %vm139_vm2, %v2596_v49, 0.0 }
0x16df   :  { %v2260_v34 = vpop.f32.mrf.mxu1 }
0x16e0   :  { %3474 = vmatmul.mubr.msk.f32.vlgmr.msra.gmra.mxu1 %vm284_vm4, %v2260_v34 }
0x16e1   :  { %v3451_v35 = vpop.f32.mrf.mxu1  ;;  %3488 = vmatpush3.msra.mxu1 %v2739_v15 }
0x16e2   :  { %3489 = vmatprep.subr.mxu1 %v2738_v18 }
0x16e3   :  { %v2425_v36 = vpop.f32.mrf.mxu1  ;;  %3490 = vmatpush3.msra.mxu1 %v2738_v18  ;;  %v3120_v18 = vld [vmem:[#allocation2 + $0x268] ss:$0 sm:$0xff] }
0x16e4   :  { %3467 = vmatmul.mubr.msk.f32.vlgmr.msra.gmra.mxu0 %vm284_vm4, %v2425_v36  ;;  %3491 = vmatprep.subr.mxu1 %v2737_v19 }
0x16e5   :  { %v3461_v37 = vpop.f32.mrf.mxu1  ;;  %3477 = vmatpush3.msra.mxu0 %v2627_v3  ;;  %3492 = vmatpush3.msra.mxu1 %v2737_v19  ;;  %v2874_v3 = vld [vmem:[#allocation2 + $0x278] sm:$0xff] }
0x16e6   :  { %3478 = vmatprep.subr.mxu0 %v2626_v4  ;;  %3493 = vmatprep.subr.mxu1 %v2736_v20 }
0x16e7   :  { %3479 = vmatpush3.msra.mxu0 %v2626_v4  ;;  %3494 = vmatpush3.msra.mxu1 %v2736_v20  ;;  %v2873_v4 = vld [vmem:[#allocation2 + $0x270] sm:$0xff] }
0x16e8   :  { %3480 = vmatprep.subr.mxu0 %v2625_v5  ;;  %3495 = vmatprep.subr.mxu1 %v2735_v21 }
0x16e9   :  { %3481 = vmatpush3.msra.mxu0 %v2625_v5  ;;  %3496 = vmatpush3.msra.mxu1 %v2735_v21 }
0x16ea   :  { %3482 = vmatprep.subr.mxu0 %v2624_v6  ;;  %3497 = vmatprep.subr.mxu1 %v2734_v22 }
0x16eb   :  { %3483 = vmatpush3.msra.mxu0 %v2624_v6  ;;  %3498 = vmatpush3.msra.mxu1 %v2734_v22 }
0x16ec   :  { %3506 = vmatprep.subr.mxu0 %v3653_v61  ;;  %3499 = vmatprep.subr.mxu1 %v2733_v23 }
0x16ed   :  { %3500 = vmatpush3.msra.mxu1 %v2733_v23 }
0x16ee   :  { %3501 = vmatprep.subr.mxu1 %v2732_v24 }
0x16ef   :  { %3502 = vmatpush3.msra.mxu1 %v2732_v24 }
0x17a0   :  { %v2571_v38 = vpop.f32.mrf.mxu1 }
0x17a2   :  { %v3475_v39 = vpop.f32.mrf.mxu1 }
0x17a4   :  { %v2498_v41 = vpop.f32.mrf.mxu0 }
0x17a5   :  { %v2572_v42 = vadd.f32 %v2571_v38, %v2498_v41 }
0x17a6   :  { %v3468_v43 = vpop.f32.mrf.mxu0 }
0x17a7   :  { %v2581_v46 = vadd.f32 %v3110_v44, %v2572_v42  ;;  %v3116_v43 = vld [vmem:[#allocation2 + $0x258] ss:$0 sm:$0xff] }
0x17a9   :  { %v2583_v47 = vadd.f32 %v2581_v46, %v3837_v17  ;;  %v3111_v17 = vld [vmem:[#allocation2 + $0x1e0] ss:$0 sm:$0xff] }
0x17ab   :  { %v2589_v48 = vsel %vm139_vm2, %v2583_v47, 0.0 }
0x17ac   :  { %2590 = vadd.xlane.f32.xlu0 %v2589_v48 }
0x17b0   :  { %2599 = vadd.xlane.f32.xlu0 %v2598_v50 }
0x1835   :  { %v2591_v51 = vpop.xlane.xlu0 %2590 }
0x1836   :  { %v2593_v52 = vmul.f32 0.03125, %v2591_v51 }
0x1838   :  { %v2595_v60 = vsub.f32 %v2583_v47, %v2593_v52 }
0x1839   :  { %v2600_v53 = vpop.xlane.xlu0 %2599 }
0x183a   :  { %v2604_v54 = vmul.f32 0.03125, %v2600_v53  ;;  %v2597_v55 = vmul.f32 %v2595_v60, %v2595_v60 }
0x183c   :  { %v2606_v57 = vadd.f32 1e-12, %v2604_v54  ;;  %v2601_v59 = vsel %vm139_vm2, %v2597_v55, 0.0 }
0x183d   :  { %2602 = vadd.xlane.f32.xlu1 %v2601_v59 }
0x183e   :  { %3590 = vrsqrt.f32 %v2606_v57 }
0x184b   :  { %v3591_v56 = vpop.eup %3590 }
0x184c   :  { %v2610_v62 = vmul.f32 %v3591_v56, %v2594_v45 }
0x184e   :  { %v2616_v1 = vmul.f32 %v3111_v17, %v2610_v62 }
0x1850   :  { %v3939_v2 = vadd.f32 %v3112_v63, %v2616_v1  ;;  %v2876_v1 = vld [vmem:[#allocation2 + $0x288] sm:$0xff] }
0x1852   :  { %3484 = vmatprep.mubr.msk.f32.mxu0 %vm139_vm2, %v3939_v2 }
0x18c6   :  { %v2603_v7 = vpop.xlane.xlu1 %2602 }
0x18c7   :  { %v2605_v8 = vmul.f32 0.03125, %v2603_v7 }
0x18c9   :  { %v2607_v9 = vadd.f32 1e-12, %v2605_v8 }
0x18cb   :  { %3592 = vrsqrt.f32 %v2607_v9 }
0x18d8   :  { %v3593_v10 = vpop.eup %3592 }
0x18d9   :  { %v2611_v12 = vmul.f32 %v3593_v10, %v2595_v60 }
0x18db   :  { %v2617_v13 = vmul.f32 %v3111_v17, %v2611_v12 }
0x18dd   :  { %v2623_v14 = vadd.f32 %v3112_v63, %v2617_v13  ;;  %v3119_v13 = vld [vmem:[#allocation2 + $0x260] ss:$0 sm:$0xff] }
0x18df   :  { %3485 = vmatmul.mubr.msk.f32.vlgmr.msra.gmra.mxu0 %vm139_vm2, %v2623_v14 }
0x18e0   :  { %3514 = vmatprep.mubr.msk.f32.mxu0 %vm3654_vm3, %v3653_v61  ;;  %3507 = vmatpush3.msra.mxu0 %v2876_v1 }
0x18e1   :  { %3508 = vmatprep.subr.mxu0 %v3653_v61 }
0x199f   :  { %v3486_v44 = vpop.f32.mrf.mxu0 }
0x19a0   :  { %v2711_v26 = vadd.f32 %v3486_v44, %v3113_v25  ;;  %v2959_v44 = vld [vmem:[#allocation2 + $0x2b0] sm:$0xff] }
0x19a1   :  { %v2705_v0 = vpop.f32.mrf.mxu0 }
0x19a2   :  { %v2717_v27 = vmul.f32 0.044715, %v2711_v26  ;;  %v2706_v28 = vadd.f32 %v3113_v25, %v2705_v0  ;;  %v2715_v40 = vmul.f32 0.5, %v2711_v26  ;;  %v2957_v0 = vld [vmem:[#allocation2 + $0x2a0] sm:$0xff] }
0x19a4   :  { %v2719_v29 = vmul.f32 %v2717_v27, %v2711_v26  ;;  %v2716_v30 = vmul.f32 0.044715, %v2706_v28  ;;  %v2714_v38 = vmul.f32 0.5, %v2706_v28  ;;  %v2956_v27 = vld [vmem:[#allocation2 + $0x298] sm:$0xff] }
0x19a6   :  { %v2721_v31 = vmul.f32 %v2719_v29, %v2711_v26  ;;  %v2718_v32 = vmul.f32 %v2716_v30, %v2706_v28 }
0x19a8   :  { %v2723_v33 = vadd.f32 %v2721_v31, %v2711_v26  ;;  %v2720_v58 = vmul.f32 %v2718_v32, %v2706_v28  ;;  %v2958_v26 = vld [vmem:[#allocation2 + $0x2a8] sm:$0xff] }
0x19aa   :  { %v2725_v16 = vmul.f32 0.7978846, %v2723_v33  ;;  %v2722_v34 = vadd.f32 %v2720_v58, %v2706_v28  ;;  %v3121_v28 = vld [vmem:[#allocation2 + $0x290] ss:$0 sm:$0xff]  ;;  %v3123_v33 = vld [vmem:[#allocation2 + $0x2b8] ss:$0 sm:$0xff] }
0x19ac   :  { %3594 = vtanh.f32 %v2725_v16  ;;  %v2724_v35 = vmul.f32 0.7978846, %v2722_v34 }
0x19ae   :  { %3596 = vtanh.f32 %v2724_v35 }
0x19b9   :  { %v3595_v36 = vpop.eup %3594 }
0x19ba   :  { %v2729_v11 = vadd.f32 1.0, %v3595_v36 }
0x19bb   :  { %v3597_v37 = vpop.eup %3596 }
0x19bc   :  { %v2728_v39 = vadd.f32 1.0, %v3597_v37  ;;  %v2731_v42 = vmul.f32 %v2729_v11, %v2715_v40 }
0x19be   :  { %v2730_v41 = vmul.f32 %v2728_v39, %v2714_v38 }
0x19c0   :  { %3503 = vmatprep.mubr.msk.f32.mxu1 %vm1407_vm6, %v2730_v41 }
0x19c1   :  { %3504 = vmatmul.mubr.msk.f32.vlgmr.msra.gmra.mxu1 %vm1407_vm6, %v2731_v42 }
0x1a81   :  { %v3505_v45 = vpop.f32.mrf.mxu1 }
0x1a82   :  { %v2823_v46 = vadd.f32 %v3505_v45, %v3116_v43 }
0x1a83   :  { %v2817_v47 = vpop.f32.mrf.mxu1 }
0x1a84   :  { %v2818_v48 = vadd.f32 %v3116_v43, %v2817_v47  ;;  %v2827_v49 = vadd.f32 %v2823_v46, %v2623_v14 }
0x1a86   :  { %v2833_v50 = vsel %vm139_vm2, %v2827_v49, 0.0  ;;  %v2826_v51 = vadd.f32 %v2818_v48, %v3939_v2  ;;  %v2875_v2 = vld [vmem:[#allocation2 + $0x280] sm:$0xff] }
0x1a87   :  { %2834 = vadd.xlane.f32.xlu0 %v2833_v50  ;;  %3509 = vmatpush3.msra.mxu0 %v2875_v2 }
0x1a88   :  { %v2830_v52 = vsel %vm139_vm2, %v2826_v51, 0.0  ;;  %3510 = vmatprep.subr.mxu0 %v3653_v61 }
0x1a89   :  { %2831 = vadd.xlane.f32.xlu1 %v2830_v52  ;;  %3511 = vmatpush3.msra.mxu0 %v2874_v3 }
0x1a8a   :  { %3512 = vmatprep.subr.mxu0 %v3653_v61 }
0x1a8b   :  { %3513 = vmatpush3.msra.mxu0 %v2873_v4 }
0x1a8c   :  { %3517 = vmatprep.subr.mxu0 %v3653_v61 }
0x1b10   :  { %v2835_v60 = vpop.xlane.xlu0 %2834 }
0x1b11   :  { %v2837_v53 = vmul.f32 0.03125, %v2835_v60 }
0x1b12   :  { %v2832_v54 = vpop.xlane.xlu1 %2831 }
0x1b13   :  { %v2839_v55 = vsub.f32 %v2827_v49, %v2837_v53  ;;  %v2836_v57 = vmul.f32 0.03125, %v2832_v54 }
0x1b15   :  { %v2838_v59 = vsub.f32 %v2826_v51, %v2836_v57  ;;  %v2841_v56 = vmul.f32 %v2839_v55, %v2839_v55 }
0x1b17   :  { %v2845_v17 = vsel %vm139_vm2, %v2841_v56, 0.0  ;;  %v2840_v62 = vmul.f32 %v2838_v59, %v2838_v59 }
0x1b18   :  { %2846 = vadd.xlane.f32.xlu0 %v2845_v17 }
0x1b19   :  { %v2842_v63 = vsel %vm139_vm2, %v2840_v62, 0.0 }
0x1b1a   :  { %2843 = vadd.xlane.f32.xlu1 %v2842_v63 }
0x1ba1   :  { %v2847_v5 = vpop.xlane.xlu0 %2846 }
0x1ba2   :  { %v2849_v6 = vmul.f32 0.03125, %v2847_v5 }
0x1ba3   :  { %v2844_v7 = vpop.xlane.xlu1 %2843 }
0x1ba4   :  { %v2851_v8 = vadd.f32 1e-12, %v2849_v6  ;;  %v2848_v9 = vmul.f32 0.03125, %v2844_v7 }
0x1ba6   :  { %3598 = vrsqrt.f32 %v2851_v8  ;;  %v2850_v10 = vadd.f32 1e-12, %v2848_v9 }
0x1ba8   :  { %3600 = vrsqrt.f32 %v2850_v10 }
0x1bb3   :  { %v3599_v12 = vpop.eup %3598 }
0x1bb4   :  { %v2855_v14 = vmul.f32 %v3599_v12, %v2839_v55 }
0x1bb5   :  { %v3601_v15 = vpop.eup %3600 }
0x1bb6   :  { %v2854_v19 = vmul.f32 %v3601_v15, %v2838_v59  ;;  %v2861_v20 = vmul.f32 %v3119_v13, %v2855_v14 }
0x1bb8   :  { %v2860_v21 = vmul.f32 %v3119_v13, %v2854_v19  ;;  %v2867_v22 = vadd.f32 %v3120_v18, %v2861_v20 }
0x1bba   :  { %v2866_v23 = vadd.f32 %v3120_v18, %v2860_v21  ;;  %v2869_v24 = vrot.slane %v2867_v22, 7 }
0x1bbc   :  { %v2872_v25 = vsel %vm2871_vm7, %v2866_v23, %v2869_v24 }
0x1bbd   :  { %3515 = vmatmul.mubr.msk.f32.vlgmr.msra.gmra.mxu0 %vm139_vm2, %v2872_v25 }
0x1bbe   :  { %3525 = vmatprep.mubr.msk.f32.mxu0 %vm3654_vm3, %v3653_v61  ;;  %3518 = vmatpush3.msra.mxu0 %v2959_v44 }
0x1bbf   :  { %3519 = vmatprep.subr.mxu0 %v3653_v61 }
0x1bc0   :  { %3520 = vmatpush3.msra.mxu0 %v2958_v26 }
0x1bc1   :  { %3521 = vmatprep.subr.mxu0 %v3653_v61 }
0x1bc2   :  { %3522 = vmatpush3.msra.mxu0 %v2957_v0 }
0x1bc3   :  { %3523 = vmatprep.subr.mxu0 %v3653_v61 }
0x1bc4   :  { %3524 = vmatpush3.msra.mxu0 %v2956_v27 }
0x1c7d   :  { %v2951_v29 = vpop.f32.mrf.mxu0 }
0x1c7e   :  { %v2952_v30 = vadd.f32 %v3121_v28, %v2951_v29 }
0x1c7f   :  { %v3516_v31 = vpop.f32.mrf.mxu0 }
0x1c80   :  { %3602 = vtanh.f32 %v2952_v30 }
0x1c8d   :  { %v3603_v32 = vpop.eup %3602 }
0x1c8e   :  { %3526 = vmatmul.mubr.msk.f32.vlgmr.msra.gmra.mxu0 %vm139_vm2, %v3603_v32 }
0x1d4e   :  { %v3034_v58 = vpop.f32.mrf.mxu0 }
0x1d4f   :  { %v3035_v16 = vadd.f32 %v3123_v33, %v3034_v58 }
0x1d50   :  { %v3527_v34 = vpop.f32.mrf.mxu0 }
0x1d51   :  { %3039 = vst.msk [vmem:[#allocation5] sm:$0x3] %vm3038_vm8, %v3035_v16 }
0x1d52   :  { %3635 = shalt.err (!%p3632_p9)
}
0x1d53   :  { %3049 = dma.vmem_to_hbm [thread:$0]  %s3047_s28, 32, %s3971_s3, [#allocation4]  }
0x1d54   :  { %3646 = dma.done.wait [#allocation4], 32  }
0x1d55   :  { %3647 = vsyncadd [#allocation4], 4294967264 }
0x1d56   :  { %3053 = vsyncpa [#allocation3], 1 }
0x1d57   :  { %3054 = vsyncpa [#allocation4], 1 }

</bundles_post_ra>
